<compile_context>
chip_gen: v6e
topology: v6e:2x2x1
jax: 0.10.0
libtpu: 0.0.40
codegen_flags: <defaults>
</compile_context>

<pallas_src>
import functools
import math

import jax
import jax.numpy as jnp
from jax import lax
from jax.experimental import pallas as pl
from jax.experimental.pallas import tpu as pltpu

# ----------------------- configuration (matches CAT_Net usage) ---------------
B = 2
SEQ = 32
D_MODEL = 128
NUM_HEADS = 4
DFF = 256
LN_EPS = 1e-6


# ------------------------------ fused encoder kernel -------------------------
def _encoder_kernel(x_ref, wqkv_ref, bqkv_ref, wo_ref, bo_ref,
                    lng_ref, lnb_ref, f1w_ref, f1b_ref, f2w_ref, f2b_ref,
                    o_ref, *, num_heads):
    Bb, S, D = x_ref.shape
    dh = D // num_heads
    scale = 1.0 / math.sqrt(dh)

    # Whole batch flattened to (B*S, D) rows -> better MXU row occupancy.
    x = x_ref[...].reshape(Bb * S, D)                       # f32

    # ---- fused QKV projection: one (B*S, D) @ (D, 3D) bf16 matmul ----------
    qkv = jnp.dot(x.astype(jnp.bfloat16), wqkv_ref[...],
                  preferred_element_type=jnp.float32) + bqkv_ref[...]

    # ---- per-head attention (static unroll over 4 heads) -------------------
    # Each head's output is folded straight into the output projection
    # (o_h @ Wo[h*dh:(h+1)*dh, :]) so no lane-axis concat is needed.
    wo = wo_ref[...]                                        # (D, D), bf16
    attn = jnp.zeros((Bb * S, D), jnp.float32)
    for h in range(num_heads):
        lo = h * dh
        qh = qkv[:, lo:lo + dh].reshape(Bb, S, dh)
        kh = qkv[:, D + lo:D + lo + dh].reshape(Bb, S, dh)
        vh = qkv[:, 2 * D + lo:2 * D + lo + dh].reshape(Bb, S, dh)

        s = jnp.einsum('bqd,bkd->bqk',
                       qh.astype(jnp.bfloat16), kh.astype(jnp.bfloat16),
                       preferred_element_type=jnp.float32) * scale
        s = s - jnp.max(s, axis=-1, keepdims=True)          # f32 softmax
        p = jnp.exp(s)
        p = p / jnp.sum(p, axis=-1, keepdims=True)

        oh = jnp.einsum('bqk,bkd->bqd',
                        p.astype(jnp.bfloat16), vh.astype(jnp.bfloat16),
                        preferred_element_type=jnp.float32)
        attn = attn + jnp.dot(oh.reshape(Bb * S, dh).astype(jnp.bfloat16),
                              wo[lo:lo + dh, :],
                              preferred_element_type=jnp.float32)
    attn = attn + bo_ref[...]

    # Shared-parameter LayerNorm (same gamma/beta used twice, as in the module).
    def layer_norm(u):
        m = jnp.mean(u, axis=-1, keepdims=True)
        c = u - m
        var = jnp.mean(c * c, axis=-1, keepdims=True)
        return c * lax.rsqrt(var + LN_EPS) * lng_ref[...] + lnb_ref[...]

    out1 = layer_norm(x + attn)                             # dropout == identity

    # ---- FFN: Linear(D->DFF) + ReLU + Linear(DFF->D), bf16 matmuls ---------
    h1 = jnp.maximum(
        jnp.dot(out1.astype(jnp.bfloat16), f1w_ref[...],
                preferred_element_type=jnp.float32) + f1b_ref[...], 0.0)
    ffn = jnp.dot(h1.astype(jnp.bfloat16), f2w_ref[...],
                  preferred_element_type=jnp.float32) + f2b_ref[...]

    out2 = layer_norm(out1 + ffn)                           # dropout == identity
    o_ref[...] = out2.reshape(Bb, S, D)


def transformer_encoder(x, p):
    Bb, S, D = x.shape
    kernel = functools.partial(_encoder_kernel, num_heads=NUM_HEADS)
    bf = lambda w: w.astype(jnp.bfloat16)   # matmul weights -> bf16 (f32 accum)

    args = (x,
            bf(p["wqkv"]), p["bqkv"],
            bf(p["wo"]), p["bo"],
            p["ln_g"], p["ln_b"],
            bf(p["f1w"]), p["f1b"],
            bf(p["f2w"]), p["f2b"])

    def spec2(a):
        return pl.BlockSpec(a.shape, lambda i: (0, 0))

    in_specs = [pl.BlockSpec((Bb, S, D), lambda i: (0, 0, 0))] + \
               [spec2(a) for a in args[1:]]

    return pl.pallas_call(
        kernel,
        out_shape=jax.ShapeDtypeStruct((Bb, S, D), jnp.float32),
        grid=(1,),                       # whole batch in one step (tiny workload)
        in_specs=in_specs,
        out_specs=pl.BlockSpec((Bb, S, D), lambda i: (0, 0, 0)),
        compiler_params=pltpu.CompilerParams(
            dimension_semantics=("arbitrary",)),
    )(*args)


# -------------------------- pure-JAX f32 reference ---------------------------
def transformer_encoder_ref(x, p):
    Bb, S, D = x.shape
    H, dh = NUM_HEADS, D // NUM_HEADS
    x2 = x.reshape(Bb * S, D)
    qkv = x2 @ p["wqkv"] + p["bqkv"]
    q, k, v = qkv[:, :D], qkv[:, D:2 * D], qkv[:, 2 * D:]

    def split(t):
        return t.reshape(Bb, S, H, dh).transpose(0, 2, 1, 3)  # (B, H, S, dh)

    q, k, v = split(q), split(k), split(v)
    s = jnp.einsum('bhqd,bhkd->bhqk', q, k) / math.sqrt(dh)
    a = jax.nn.softmax(s, axis=-1)
    o = jnp.einsum('bhqk,bhkd->bhqd', a, v).transpose(0, 2, 1, 3).reshape(Bb * S, D)
    attn = o @ p["wo"] + p["bo"]

    def ln(u):
        m = u.mean(-1, keepdims=True)
        c = u - m
        var = (c * c).mean(-1, keepdims=True)
        return c * lax.rsqrt(var + LN_EPS) * p["ln_g"] + p["ln_b"]

    out1 = ln(x2 + attn)
    ffn = jnp.maximum(out1 @ p["f1w"] + p["f1b"], 0.0) @ p["f2w"] + p["f2b"]
    return ln(out1 + ffn).reshape(Bb, S, D)


# ------------------------------- parameter init -------------------------------
def init_params(key):
    keys = iter(jax.random.split(key, 16))

    def nrm(shape, std=0.05):
        return std * jax.random.normal(next(keys), shape, jnp.float32)

    p = {}
    p["wqkv"] = nrm((D_MODEL, 3 * D_MODEL))   # [Wq | Wk | Wv], pre-transposed
    p["bqkv"] = nrm((1, 3 * D_MODEL))
    p["wo"] = nrm((D_MODEL, D_MODEL))
    p["bo"] = nrm((1, D_MODEL))
    p["ln_g"] = 1.0 + nrm((1, D_MODEL))
    p["ln_b"] = nrm((1, D_MODEL))
    p["f1w"] = nrm((D_MODEL, DFF))
    p["f1b"] = nrm((1, DFF))
    p["f2w"] = nrm((DFF, D_MODEL))
    p["f2b"] = nrm((1, D_MODEL))
    return p


if __name__ == "__main__":
    key = jax.random.PRNGKey(0)
    pkey, xkey = jax.random.split(key)
    params = init_params(pkey)
    x = jax.random.normal(xkey, (B, SEQ, D_MODEL), jnp.float32)

    out = jax.jit(transformer_encoder)(x, params)
    out = jax.block_until_ready(out)

    assert out.shape == (B, SEQ, D_MODEL)
    assert bool(jnp.all(jnp.isfinite(out)))

    # Compare against a pure-JAX f32 reference (loose tolerance: kernel matmul
    # operands are bf16 with f32 accumulation).
    ref = transformer_encoder_ref(x, params)
    max_err = float(jnp.max(jnp.abs(out - ref)))
    assert max_err < 7.5e-2, f"max abs error {max_err}"

    print("KERNEL_OK")
</pallas_src>

<mosaic_0001>
module attributes {stable_mosaic.version = 11 : i64} {
  func.func @_encoder_kernel(%arg0: i32, %arg1: memref<2x32x128xf32, #tpu.memory_space<vmem>>, %arg2: memref<128x384xbf16, #tpu.memory_space<vmem>>, %arg3: memref<1x384xf32, #tpu.memory_space<vmem>>, %arg4: memref<128x128xbf16, #tpu.memory_space<vmem>>, %arg5: memref<1x128xf32, #tpu.memory_space<vmem>>, %arg6: memref<1x128xf32, #tpu.memory_space<vmem>>, %arg7: memref<1x128xf32, #tpu.memory_space<vmem>>, %arg8: memref<128x256xbf16, #tpu.memory_space<vmem>>, %arg9: memref<1x256xf32, #tpu.memory_space<vmem>>, %arg10: memref<256x128xbf16, #tpu.memory_space<vmem>>, %arg11: memref<1x128xf32, #tpu.memory_space<vmem>>, %arg12: memref<2x32x128xf32, #tpu.memory_space<vmem>>) attributes {dimension_semantics = [#tpu.dimension_semantics<arbitrary>], iteration_bounds = array<i64: 1>, scalar_prefetch = 0 : i64, scratch_operands = 0 : i64, tpu.core_type = #tpu.core_type<tc>, window_params = [{pipeline_mode = #tpu.pipeline_mode<synchronous>, transform_indices = @transform_0, window_bounds = array<i64: 2, 32, 128>}, {pipeline_mode = #tpu.pipeline_mode<synchronous>, transform_indices = @transform_1, window_bounds = array<i64: 128, 384>}, {pipeline_mode = #tpu.pipeline_mode<synchronous>, transform_indices = @transform_2, window_bounds = array<i64: 1, 384>}, {pipeline_mode = #tpu.pipeline_mode<synchronous>, transform_indices = @transform_3, window_bounds = array<i64: 128, 128>}, {pipeline_mode = #tpu.pipeline_mode<synchronous>, transform_indices = @transform_4, window_bounds = array<i64: 1, 128>}, {pipeline_mode = #tpu.pipeline_mode<synchronous>, transform_indices = @transform_5, window_bounds = array<i64: 1, 128>}, {pipeline_mode = #tpu.pipeline_mode<synchronous>, transform_indices = @transform_6, window_bounds = array<i64: 1, 128>}, {pipeline_mode = #tpu.pipeline_mode<synchronous>, transform_indices = @transform_7, window_bounds = array<i64: 128, 256>}, {pipeline_mode = #tpu.pipeline_mode<synchronous>, transform_indices = @transform_8, window_bounds = array<i64: 1, 256>}, {pipeline_mode = #tpu.pipeline_mode<synchronous>, transform_indices = @transform_9, window_bounds = array<i64: 256, 128>}, {pipeline_mode = #tpu.pipeline_mode<synchronous>, transform_indices = @transform_10, window_bounds = array<i64: 1, 128>}, {pipeline_mode = #tpu.pipeline_mode<synchronous>, transform_indices = @transform_11, window_bounds = array<i64: 2, 32, 128>}]} {
    %c0 = arith.constant 0 : index
    %c0_0 = arith.constant 0 : index
    %c0_1 = arith.constant 0 : index
    %0 = vector.load %arg1[%c0, %c0_0, %c0_1] : memref<2x32x128xf32, #tpu.memory_space<vmem>>, vector<2x32x128xf32>
    %1 = vector.shape_cast %0 : vector<2x32x128xf32> to vector<64x128xf32>
    %2 = arith.truncf %1 : vector<64x128xf32> to vector<64x128xbf16>
    %c0_2 = arith.constant 0 : index
    %c0_3 = arith.constant 0 : index
    %3 = vector.load %arg2[%c0_2, %c0_3] : memref<128x384xbf16, #tpu.memory_space<vmem>>, vector<128x384xbf16>
    %cst = arith.constant dense<0.000000e+00> : vector<64x384xf32>
    %4 = tpu.matmul %2, %3, %cst {dimension_numbers = #tpu.dot_dimension_numbers<[1], [0], [0], [1], [0, 0, 1, 1], [], []>} : vector<64x128xbf16>, vector<128x384xbf16>, vector<64x384xf32> -> vector<64x384xf32>
    %c0_4 = arith.constant 0 : index
    %c0_5 = arith.constant 0 : index
    %5 = vector.load %arg3[%c0_4, %c0_5] : memref<1x384xf32, #tpu.memory_space<vmem>>, vector<1x384xf32>
    %6 = vector.broadcast %5 : vector<1x384xf32> to vector<64x384xf32>
    %7 = arith.addf %4, %6 : vector<64x384xf32>
    %c0_6 = arith.constant 0 : index
    %c0_7 = arith.constant 0 : index
    %8 = vector.load %arg4[%c0_6, %c0_7] : memref<128x128xbf16, #tpu.memory_space<vmem>>, vector<128x128xbf16>
    %cst_8 = arith.constant 0.000000e+00 : f32
    %9 = vector.broadcast %cst_8 : f32 to vector<64x128xf32>
    %10 = vector.extract_strided_slice %7 {offsets = [0, 0], sizes = [64, 32], strides = [1, 1]} : vector<64x384xf32> to vector<64x32xf32>
    %11 = vector.shape_cast %10 : vector<64x32xf32> to vector<2x32x32xf32>
    %12 = vector.extract_strided_slice %7 {offsets = [0, 128], sizes = [64, 32], strides = [1, 1]} : vector<64x384xf32> to vector<64x32xf32>
    %13 = vector.shape_cast %12 : vector<64x32xf32> to vector<2x32x32xf32>
    %14 = vector.extract_strided_slice %7 {offsets = [0, 256], sizes = [64, 32], strides = [1, 1]} : vector<64x384xf32> to vector<64x32xf32>
    %15 = vector.shape_cast %14 : vector<64x32xf32> to vector<2x32x32xf32>
    %16 = arith.truncf %11 : vector<2x32x32xf32> to vector<2x32x32xbf16>
    %17 = arith.truncf %13 : vector<2x32x32xf32> to vector<2x32x32xbf16>
    "tpu.trace_start"() <{level = 10 : i32, message = "bqd,bkd->bqk"}> : () -> ()
    %cst_9 = arith.constant dense<0.000000e+00> : vector<2x32x32xf32>
    %18 = tpu.matmul %16, %17, %cst_9 {dimension_numbers = #tpu.dot_dimension_numbers<[2], [2], [1], [1], [0, 0, 0, 1, 1, 1], [0], [0]>} : vector<2x32x32xbf16>, vector<2x32x32xbf16>, vector<2x32x32xf32> -> vector<2x32x32xf32>
    "tpu.trace_stop"() : () -> ()
    %cst_10 = arith.constant 0.176776692 : f32
    %19 = vector.broadcast %cst_10 : f32 to vector<2x32x32xf32>
    %20 = arith.mulf %18, %19 : vector<2x32x32xf32>
    %cst_11 = arith.constant dense<0xFF800000> : vector<2x32xf32>
    %21 = vector.multi_reduction <maximumf>, %20, %cst_11 [2] : vector<2x32x32xf32> to vector<2x32xf32>
    %22 = vector.shape_cast %21 : vector<2x32xf32> to vector<2x32x1xf32>
    %23 = vector.broadcast %22 : vector<2x32x1xf32> to vector<2x32x32xf32>
    %24 = arith.subf %20, %23 : vector<2x32x32xf32>
    %25 = math.exp %24 : vector<2x32x32xf32>
    %cst_12 = arith.constant dense<0.000000e+00> : vector<2x32xf32>
    %26 = vector.multi_reduction <add>, %25, %cst_12 [2] : vector<2x32x32xf32> to vector<2x32xf32>
    %27 = vector.shape_cast %26 : vector<2x32xf32> to vector<2x32x1xf32>
    %28 = vector.broadcast %27 : vector<2x32x1xf32> to vector<2x32x32xf32>
    %29 = arith.divf %25, %28 : vector<2x32x32xf32>
    %30 = arith.truncf %29 : vector<2x32x32xf32> to vector<2x32x32xbf16>
    %31 = arith.truncf %15 : vector<2x32x32xf32> to vector<2x32x32xbf16>
    "tpu.trace_start"() <{level = 10 : i32, message = "bqk,bkd->bqd"}> : () -> ()
    %cst_13 = arith.constant dense<0.000000e+00> : vector<2x32x32xf32>
    %32 = tpu.matmul %30, %31, %cst_13 {dimension_numbers = #tpu.dot_dimension_numbers<[2], [1], [1], [2], [0, 0, 0, 1, 1, 2], [0], [0]>} : vector<2x32x32xbf16>, vector<2x32x32xbf16>, vector<2x32x32xf32> -> vector<2x32x32xf32>
    "tpu.trace_stop"() : () -> ()
    %33 = vector.shape_cast %32 : vector<2x32x32xf32> to vector<64x32xf32>
    %34 = arith.truncf %33 : vector<64x32xf32> to vector<64x32xbf16>
    %35 = vector.extract_strided_slice %8 {offsets = [0, 0], sizes = [32, 128], strides = [1, 1]} : vector<128x128xbf16> to vector<32x128xbf16>
    %cst_14 = arith.constant dense<0.000000e+00> : vector<64x128xf32>
    %36 = tpu.matmul %34, %35, %cst_14 {dimension_numbers = #tpu.dot_dimension_numbers<[1], [0], [0], [1], [0, 0, 1, 1], [], []>} : vector<64x32xbf16>, vector<32x128xbf16>, vector<64x128xf32> -> vector<64x128xf32>
    %37 = arith.addf %9, %36 : vector<64x128xf32>
    %38 = vector.extract_strided_slice %7 {offsets = [0, 32], sizes = [64, 32], strides = [1, 1]} : vector<64x384xf32> to vector<64x32xf32>
    %39 = vector.shape_cast %38 : vector<64x32xf32> to vector<2x32x32xf32>
    %40 = vector.extract_strided_slice %7 {offsets = [0, 160], sizes = [64, 32], strides = [1, 1]} : vector<64x384xf32> to vector<64x32xf32>
    %41 = vector.shape_cast %40 : vector<64x32xf32> to vector<2x32x32xf32>
    %42 = vector.extract_strided_slice %7 {offsets = [0, 288], sizes = [64, 32], strides = [1, 1]} : vector<64x384xf32> to vector<64x32xf32>
    %43 = vector.shape_cast %42 : vector<64x32xf32> to vector<2x32x32xf32>
    %44 = arith.truncf %39 : vector<2x32x32xf32> to vector<2x32x32xbf16>
    %45 = arith.truncf %41 : vector<2x32x32xf32> to vector<2x32x32xbf16>
    "tpu.trace_start"() <{level = 10 : i32, message = "bqd,bkd->bqk"}> : () -> ()
    %cst_15 = arith.constant dense<0.000000e+00> : vector<2x32x32xf32>
    %46 = tpu.matmul %44, %45, %cst_15 {dimension_numbers = #tpu.dot_dimension_numbers<[2], [2], [1], [1], [0, 0, 0, 1, 1, 1], [0], [0]>} : vector<2x32x32xbf16>, vector<2x32x32xbf16>, vector<2x32x32xf32> -> vector<2x32x32xf32>
    "tpu.trace_stop"() : () -> ()
    %cst_16 = arith.constant 0.176776692 : f32
    %47 = vector.broadcast %cst_16 : f32 to vector<2x32x32xf32>
    %48 = arith.mulf %46, %47 : vector<2x32x32xf32>
    %cst_17 = arith.constant dense<0xFF800000> : vector<2x32xf32>
    %49 = vector.multi_reduction <maximumf>, %48, %cst_17 [2] : vector<2x32x32xf32> to vector<2x32xf32>
    %50 = vector.shape_cast %49 : vector<2x32xf32> to vector<2x32x1xf32>
    %51 = vector.broadcast %50 : vector<2x32x1xf32> to vector<2x32x32xf32>
    %52 = arith.subf %48, %51 : vector<2x32x32xf32>
    %53 = math.exp %52 : vector<2x32x32xf32>
    %cst_18 = arith.constant dense<0.000000e+00> : vector<2x32xf32>
    %54 = vector.multi_reduction <add>, %53, %cst_18 [2] : vector<2x32x32xf32> to vector<2x32xf32>
    %55 = vector.shape_cast %54 : vector<2x32xf32> to vector<2x32x1xf32>
    %56 = vector.broadcast %55 : vector<2x32x1xf32> to vector<2x32x32xf32>
    %57 = arith.divf %53, %56 : vector<2x32x32xf32>
    %58 = arith.truncf %57 : vector<2x32x32xf32> to vector<2x32x32xbf16>
    %59 = arith.truncf %43 : vector<2x32x32xf32> to vector<2x32x32xbf16>
    "tpu.trace_start"() <{level = 10 : i32, message = "bqk,bkd->bqd"}> : () -> ()
    %cst_19 = arith.constant dense<0.000000e+00> : vector<2x32x32xf32>
    %60 = tpu.matmul %58, %59, %cst_19 {dimension_numbers = #tpu.dot_dimension_numbers<[2], [1], [1], [2], [0, 0, 0, 1, 1, 2], [0], [0]>} : vector<2x32x32xbf16>, vector<2x32x32xbf16>, vector<2x32x32xf32> -> vector<2x32x32xf32>
    "tpu.trace_stop"() : () -> ()
    %61 = vector.shape_cast %60 : vector<2x32x32xf32> to vector<64x32xf32>
    %62 = arith.truncf %61 : vector<64x32xf32> to vector<64x32xbf16>
    %63 = vector.extract_strided_slice %8 {offsets = [32, 0], sizes = [32, 128], strides = [1, 1]} : vector<128x128xbf16> to vector<32x128xbf16>
    %cst_20 = arith.constant dense<0.000000e+00> : vector<64x128xf32>
    %64 = tpu.matmul %62, %63, %cst_20 {dimension_numbers = #tpu.dot_dimension_numbers<[1], [0], [0], [1], [0, 0, 1, 1], [], []>} : vector<64x32xbf16>, vector<32x128xbf16>, vector<64x128xf32> -> vector<64x128xf32>
    %65 = arith.addf %37, %64 : vector<64x128xf32>
    %66 = vector.extract_strided_slice %7 {offsets = [0, 64], sizes = [64, 32], strides = [1, 1]} : vector<64x384xf32> to vector<64x32xf32>
    %67 = vector.shape_cast %66 : vector<64x32xf32> to vector<2x32x32xf32>
    %68 = vector.extract_strided_slice %7 {offsets = [0, 192], sizes = [64, 32], strides = [1, 1]} : vector<64x384xf32> to vector<64x32xf32>
    %69 = vector.shape_cast %68 : vector<64x32xf32> to vector<2x32x32xf32>
    %70 = vector.extract_strided_slice %7 {offsets = [0, 320], sizes = [64, 32], strides = [1, 1]} : vector<64x384xf32> to vector<64x32xf32>
    %71 = vector.shape_cast %70 : vector<64x32xf32> to vector<2x32x32xf32>
    %72 = arith.truncf %67 : vector<2x32x32xf32> to vector<2x32x32xbf16>
    %73 = arith.truncf %69 : vector<2x32x32xf32> to vector<2x32x32xbf16>
    "tpu.trace_start"() <{level = 10 : i32, message = "bqd,bkd->bqk"}> : () -> ()
    %cst_21 = arith.constant dense<0.000000e+00> : vector<2x32x32xf32>
    %74 = tpu.matmul %72, %73, %cst_21 {dimension_numbers = #tpu.dot_dimension_numbers<[2], [2], [1], [1], [0, 0, 0, 1, 1, 1], [0], [0]>} : vector<2x32x32xbf16>, vector<2x32x32xbf16>, vector<2x32x32xf32> -> vector<2x32x32xf32>
    "tpu.trace_stop"() : () -> ()
    %cst_22 = arith.constant 0.176776692 : f32
    %75 = vector.broadcast %cst_22 : f32 to vector<2x32x32xf32>
    %76 = arith.mulf %74, %75 : vector<2x32x32xf32>
    %cst_23 = arith.constant dense<0xFF800000> : vector<2x32xf32>
    %77 = vector.multi_reduction <maximumf>, %76, %cst_23 [2] : vector<2x32x32xf32> to vector<2x32xf32>
    %78 = vector.shape_cast %77 : vector<2x32xf32> to vector<2x32x1xf32>
    %79 = vector.broadcast %78 : vector<2x32x1xf32> to vector<2x32x32xf32>
    %80 = arith.subf %76, %79 : vector<2x32x32xf32>
    %81 = math.exp %80 : vector<2x32x32xf32>
    %cst_24 = arith.constant dense<0.000000e+00> : vector<2x32xf32>
    %82 = vector.multi_reduction <add>, %81, %cst_24 [2] : vector<2x32x32xf32> to vector<2x32xf32>
    %83 = vector.shape_cast %82 : vector<2x32xf32> to vector<2x32x1xf32>
    %84 = vector.broadcast %83 : vector<2x32x1xf32> to vector<2x32x32xf32>
    %85 = arith.divf %81, %84 : vector<2x32x32xf32>
    %86 = arith.truncf %85 : vector<2x32x32xf32> to vector<2x32x32xbf16>
    %87 = arith.truncf %71 : vector<2x32x32xf32> to vector<2x32x32xbf16>
    "tpu.trace_start"() <{level = 10 : i32, message = "bqk,bkd->bqd"}> : () -> ()
    %cst_25 = arith.constant dense<0.000000e+00> : vector<2x32x32xf32>
    %88 = tpu.matmul %86, %87, %cst_25 {dimension_numbers = #tpu.dot_dimension_numbers<[2], [1], [1], [2], [0, 0, 0, 1, 1, 2], [0], [0]>} : vector<2x32x32xbf16>, vector<2x32x32xbf16>, vector<2x32x32xf32> -> vector<2x32x32xf32>
    "tpu.trace_stop"() : () -> ()
    %89 = vector.shape_cast %88 : vector<2x32x32xf32> to vector<64x32xf32>
    %90 = arith.truncf %89 : vector<64x32xf32> to vector<64x32xbf16>
    %91 = vector.extract_strided_slice %8 {offsets = [64, 0], sizes = [32, 128], strides = [1, 1]} : vector<128x128xbf16> to vector<32x128xbf16>
    %cst_26 = arith.constant dense<0.000000e+00> : vector<64x128xf32>
    %92 = tpu.matmul %90, %91, %cst_26 {dimension_numbers = #tpu.dot_dimension_numbers<[1], [0], [0], [1], [0, 0, 1, 1], [], []>} : vector<64x32xbf16>, vector<32x128xbf16>, vector<64x128xf32> -> vector<64x128xf32>
    %93 = arith.addf %65, %92 : vector<64x128xf32>
    %94 = vector.extract_strided_slice %7 {offsets = [0, 96], sizes = [64, 32], strides = [1, 1]} : vector<64x384xf32> to vector<64x32xf32>
    %95 = vector.shape_cast %94 : vector<64x32xf32> to vector<2x32x32xf32>
    %96 = vector.extract_strided_slice %7 {offsets = [0, 224], sizes = [64, 32], strides = [1, 1]} : vector<64x384xf32> to vector<64x32xf32>
    %97 = vector.shape_cast %96 : vector<64x32xf32> to vector<2x32x32xf32>
    %98 = vector.extract_strided_slice %7 {offsets = [0, 352], sizes = [64, 32], strides = [1, 1]} : vector<64x384xf32> to vector<64x32xf32>
    %99 = vector.shape_cast %98 : vector<64x32xf32> to vector<2x32x32xf32>
    %100 = arith.truncf %95 : vector<2x32x32xf32> to vector<2x32x32xbf16>
    %101 = arith.truncf %97 : vector<2x32x32xf32> to vector<2x32x32xbf16>
    "tpu.trace_start"() <{level = 10 : i32, message = "bqd,bkd->bqk"}> : () -> ()
    %cst_27 = arith.constant dense<0.000000e+00> : vector<2x32x32xf32>
    %102 = tpu.matmul %100, %101, %cst_27 {dimension_numbers = #tpu.dot_dimension_numbers<[2], [2], [1], [1], [0, 0, 0, 1, 1, 1], [0], [0]>} : vector<2x32x32xbf16>, vector<2x32x32xbf16>, vector<2x32x32xf32> -> vector<2x32x32xf32>
    "tpu.trace_stop"() : () -> ()
    %cst_28 = arith.constant 0.176776692 : f32
    %103 = vector.broadcast %cst_28 : f32 to vector<2x32x32xf32>
    %104 = arith.mulf %102, %103 : vector<2x32x32xf32>
    %cst_29 = arith.constant dense<0xFF800000> : vector<2x32xf32>
    %105 = vector.multi_reduction <maximumf>, %104, %cst_29 [2] : vector<2x32x32xf32> to vector<2x32xf32>
    %106 = vector.shape_cast %105 : vector<2x32xf32> to vector<2x32x1xf32>
    %107 = vector.broadcast %106 : vector<2x32x1xf32> to vector<2x32x32xf32>
    %108 = arith.subf %104, %107 : vector<2x32x32xf32>
    %109 = math.exp %108 : vector<2x32x32xf32>
    %cst_30 = arith.constant dense<0.000000e+00> : vector<2x32xf32>
    %110 = vector.multi_reduction <add>, %109, %cst_30 [2] : vector<2x32x32xf32> to vector<2x32xf32>
    %111 = vector.shape_cast %110 : vector<2x32xf32> to vector<2x32x1xf32>
    %112 = vector.broadcast %111 : vector<2x32x1xf32> to vector<2x32x32xf32>
    %113 = arith.divf %109, %112 : vector<2x32x32xf32>
    %114 = arith.truncf %113 : vector<2x32x32xf32> to vector<2x32x32xbf16>
    %115 = arith.truncf %99 : vector<2x32x32xf32> to vector<2x32x32xbf16>
    "tpu.trace_start"() <{level = 10 : i32, message = "bqk,bkd->bqd"}> : () -> ()
    %cst_31 = arith.constant dense<0.000000e+00> : vector<2x32x32xf32>
    %116 = tpu.matmul %114, %115, %cst_31 {dimension_numbers = #tpu.dot_dimension_numbers<[2], [1], [1], [2], [0, 0, 0, 1, 1, 2], [0], [0]>} : vector<2x32x32xbf16>, vector<2x32x32xbf16>, vector<2x32x32xf32> -> vector<2x32x32xf32>
    "tpu.trace_stop"() : () -> ()
    %117 = vector.shape_cast %116 : vector<2x32x32xf32> to vector<64x32xf32>
    %118 = arith.truncf %117 : vector<64x32xf32> to vector<64x32xbf16>
    %119 = vector.extract_strided_slice %8 {offsets = [96, 0], sizes = [32, 128], strides = [1, 1]} : vector<128x128xbf16> to vector<32x128xbf16>
    %cst_32 = arith.constant dense<0.000000e+00> : vector<64x128xf32>
    %120 = tpu.matmul %118, %119, %cst_32 {dimension_numbers = #tpu.dot_dimension_numbers<[1], [0], [0], [1], [0, 0, 1, 1], [], []>} : vector<64x32xbf16>, vector<32x128xbf16>, vector<64x128xf32> -> vector<64x128xf32>
    %121 = arith.addf %93, %120 : vector<64x128xf32>
    %c0_33 = arith.constant 0 : index
    %c0_34 = arith.constant 0 : index
    %122 = vector.load %arg5[%c0_33, %c0_34] : memref<1x128xf32, #tpu.memory_space<vmem>>, vector<1x128xf32>
    %123 = vector.broadcast %122 : vector<1x128xf32> to vector<64x128xf32>
    %124 = arith.addf %121, %123 : vector<64x128xf32>
    %125 = arith.addf %1, %124 : vector<64x128xf32>
    %cst_35 = arith.constant dense<0.000000e+00> : vector<64xf32>
    %126 = vector.multi_reduction <add>, %125, %cst_35 [1] : vector<64x128xf32> to vector<64xf32>
    %127 = vector.shape_cast %126 : vector<64xf32> to vector<64x1xf32>
    %cst_36 = arith.constant 1.280000e+02 : f32
    %128 = vector.broadcast %cst_36 : f32 to vector<64x1xf32>
    %129 = arith.divf %127, %128 : vector<64x1xf32>
    %130 = vector.broadcast %129 : vector<64x1xf32> to vector<64x128xf32>
    %131 = arith.subf %125, %130 : vector<64x128xf32>
    %132 = arith.mulf %131, %131 : vector<64x128xf32>
    %cst_37 = arith.constant dense<0.000000e+00> : vector<64xf32>
    %133 = vector.multi_reduction <add>, %132, %cst_37 [1] : vector<64x128xf32> to vector<64xf32>
    %134 = vector.shape_cast %133 : vector<64xf32> to vector<64x1xf32>
    %cst_38 = arith.constant 1.280000e+02 : f32
    %135 = vector.broadcast %cst_38 : f32 to vector<64x1xf32>
    %136 = arith.divf %134, %135 : vector<64x1xf32>
    %cst_39 = arith.constant 9.99999997E-7 : f32
    %137 = vector.broadcast %cst_39 : f32 to vector<64x1xf32>
    %138 = arith.addf %136, %137 : vector<64x1xf32>
    %139 = math.rsqrt %138 : vector<64x1xf32>
    %140 = vector.broadcast %139 : vector<64x1xf32> to vector<64x128xf32>
    %141 = arith.mulf %131, %140 : vector<64x128xf32>
    %c0_40 = arith.constant 0 : index
    %c0_41 = arith.constant 0 : index
    %142 = vector.load %arg6[%c0_40, %c0_41] : memref<1x128xf32, #tpu.memory_space<vmem>>, vector<1x128xf32>
    %143 = vector.broadcast %142 : vector<1x128xf32> to vector<64x128xf32>
    %144 = arith.mulf %141, %143 : vector<64x128xf32>
    %c0_42 = arith.constant 0 : index
    %c0_43 = arith.constant 0 : index
    %145 = vector.load %arg7[%c0_42, %c0_43] : memref<1x128xf32, #tpu.memory_space<vmem>>, vector<1x128xf32>
    %146 = vector.broadcast %145 : vector<1x128xf32> to vector<64x128xf32>
    %147 = arith.addf %144, %146 : vector<64x128xf32>
    %148 = arith.truncf %147 : vector<64x128xf32> to vector<64x128xbf16>
    %c0_44 = arith.constant 0 : index
    %c0_45 = arith.constant 0 : index
    %149 = vector.load %arg8[%c0_44, %c0_45] : memref<128x256xbf16, #tpu.memory_space<vmem>>, vector<128x256xbf16>
    %cst_46 = arith.constant dense<0.000000e+00> : vector<64x256xf32>
    %150 = tpu.matmul %148, %149, %cst_46 {dimension_numbers = #tpu.dot_dimension_numbers<[1], [0], [0], [1], [0, 0, 1, 1], [], []>} : vector<64x128xbf16>, vector<128x256xbf16>, vector<64x256xf32> -> vector<64x256xf32>
    %c0_47 = arith.constant 0 : index
    %c0_48 = arith.constant 0 : index
    %151 = vector.load %arg9[%c0_47, %c0_48] : memref<1x256xf32, #tpu.memory_space<vmem>>, vector<1x256xf32>
    %152 = vector.broadcast %151 : vector<1x256xf32> to vector<64x256xf32>
    %153 = arith.addf %150, %152 : vector<64x256xf32>
    %cst_49 = arith.constant 0.000000e+00 : f32
    %154 = vector.broadcast %cst_49 : f32 to vector<64x256xf32>
    %155 = arith.maximumf %153, %154 : vector<64x256xf32>
    %156 = arith.truncf %155 : vector<64x256xf32> to vector<64x256xbf16>
    %c0_50 = arith.constant 0 : index
    %c0_51 = arith.constant 0 : index
    %157 = vector.load %arg10[%c0_50, %c0_51] : memref<256x128xbf16, #tpu.memory_space<vmem>>, vector<256x128xbf16>
    %cst_52 = arith.constant dense<0.000000e+00> : vector<64x128xf32>
    %158 = tpu.matmul %156, %157, %cst_52 {dimension_numbers = #tpu.dot_dimension_numbers<[1], [0], [0], [1], [0, 0, 1, 1], [], []>} : vector<64x256xbf16>, vector<256x128xbf16>, vector<64x128xf32> -> vector<64x128xf32>
    %c0_53 = arith.constant 0 : index
    %c0_54 = arith.constant 0 : index
    %159 = vector.load %arg11[%c0_53, %c0_54] : memref<1x128xf32, #tpu.memory_space<vmem>>, vector<1x128xf32>
    %160 = vector.broadcast %159 : vector<1x128xf32> to vector<64x128xf32>
    %161 = arith.addf %158, %160 : vector<64x128xf32>
    %162 = arith.addf %147, %161 : vector<64x128xf32>
    %cst_55 = arith.constant dense<0.000000e+00> : vector<64xf32>
    %163 = vector.multi_reduction <add>, %162, %cst_55 [1] : vector<64x128xf32> to vector<64xf32>
    %164 = vector.shape_cast %163 : vector<64xf32> to vector<64x1xf32>
    %cst_56 = arith.constant 1.280000e+02 : f32
    %165 = vector.broadcast %cst_56 : f32 to vector<64x1xf32>
    %166 = arith.divf %164, %165 : vector<64x1xf32>
    %167 = vector.broadcast %166 : vector<64x1xf32> to vector<64x128xf32>
    %168 = arith.subf %162, %167 : vector<64x128xf32>
    %169 = arith.mulf %168, %168 : vector<64x128xf32>
    %cst_57 = arith.constant dense<0.000000e+00> : vector<64xf32>
    %170 = vector.multi_reduction <add>, %169, %cst_57 [1] : vector<64x128xf32> to vector<64xf32>
    %171 = vector.shape_cast %170 : vector<64xf32> to vector<64x1xf32>
    %cst_58 = arith.constant 1.280000e+02 : f32
    %172 = vector.broadcast %cst_58 : f32 to vector<64x1xf32>
    %173 = arith.divf %171, %172 : vector<64x1xf32>
    %cst_59 = arith.constant 9.99999997E-7 : f32
    %174 = vector.broadcast %cst_59 : f32 to vector<64x1xf32>
    %175 = arith.addf %173, %174 : vector<64x1xf32>
    %176 = math.rsqrt %175 : vector<64x1xf32>
    %177 = vector.broadcast %176 : vector<64x1xf32> to vector<64x128xf32>
    %178 = arith.mulf %168, %177 : vector<64x128xf32>
    %c0_60 = arith.constant 0 : index
    %c0_61 = arith.constant 0 : index
    %179 = vector.load %arg6[%c0_60, %c0_61] : memref<1x128xf32, #tpu.memory_space<vmem>>, vector<1x128xf32>
    %180 = vector.broadcast %179 : vector<1x128xf32> to vector<64x128xf32>
    %181 = arith.mulf %178, %180 : vector<64x128xf32>
    %c0_62 = arith.constant 0 : index
    %c0_63 = arith.constant 0 : index
    %182 = vector.load %arg7[%c0_62, %c0_63] : memref<1x128xf32, #tpu.memory_space<vmem>>, vector<1x128xf32>
    %183 = vector.broadcast %182 : vector<1x128xf32> to vector<64x128xf32>
    %184 = arith.addf %181, %183 : vector<64x128xf32>
    %185 = vector.shape_cast %184 : vector<64x128xf32> to vector<2x32x128xf32>
    %c0_64 = arith.constant 0 : index
    %c0_65 = arith.constant 0 : index
    %c0_66 = arith.constant 0 : index
    %186 = vector.load %arg12[%c0_64, %c0_65, %c0_66] : memref<2x32x128xf32, #tpu.memory_space<vmem>>, vector<2x32x128xf32>
    tpu.vector_store %arg12[%c0_64, %c0_65, %c0_66], %185 {strides = array<i32>} : memref<2x32x128xf32, #tpu.memory_space<vmem>>, vector<2x32x128xf32>,
    return
  }
  func.func @transform_0(%arg0: i32) -> (i32, i32, i32) {
    %c0_i32 = arith.constant 0 : i32
    %c0_i32_0 = arith.constant 0 : i32
    %c0_i32_1 = arith.constant 0 : i32
    %c0_i32_2 = arith.constant 0 : i32
    return %c0_i32, %c0_i32_0, %c0_i32_1 : i32, i32, i32
  }
  func.func @transform_1(%arg0: i32) -> (i32, i32) {
    %c0_i32 = arith.constant 0 : i32
    %c0_i32_0 = arith.constant 0 : i32
    %c0_i32_1 = arith.constant 0 : i32
    return %c0_i32, %c0_i32_0 : i32, i32
  }
  func.func @transform_2(%arg0: i32) -> (i32, i32) {
    %c0_i32 = arith.constant 0 : i32
    %c0_i32_0 = arith.constant 0 : i32
    %c0_i32_1 = arith.constant 0 : i32
    return %c0_i32, %c0_i32_0 : i32, i32
  }
  func.func @transform_3(%arg0: i32) -> (i32, i32) {
    %c0_i32 = arith.constant 0 : i32
    %c0_i32_0 = arith.constant 0 : i32
    %c0_i32_1 = arith.constant 0 : i32
    return %c0_i32, %c0_i32_0 : i32, i32
  }
  func.func @transform_4(%arg0: i32) -> (i32, i32) {
    %c0_i32 = arith.constant 0 : i32
    %c0_i32_0 = arith.constant 0 : i32
    %c0_i32_1 = arith.constant 0 : i32
    return %c0_i32, %c0_i32_0 : i32, i32
  }
  func.func @transform_5(%arg0: i32) -> (i32, i32) {
    %c0_i32 = arith.constant 0 : i32
    %c0_i32_0 = arith.constant 0 : i32
    %c0_i32_1 = arith.constant 0 : i32
    return %c0_i32, %c0_i32_0 : i32, i32
  }
  func.func @transform_6(%arg0: i32) -> (i32, i32) {
    %c0_i32 = arith.constant 0 : i32
    %c0_i32_0 = arith.constant 0 : i32
    %c0_i32_1 = arith.constant 0 : i32
    return %c0_i32, %c0_i32_0 : i32, i32
  }
  func.func @transform_7(%arg0: i32) -> (i32, i32) {
    %c0_i32 = arith.constant 0 : i32
    %c0_i32_0 = arith.constant 0 : i32
    %c0_i32_1 = arith.constant 0 : i32
    return %c0_i32, %c0_i32_0 : i32, i32
  }
  func.func @transform_8(%arg0: i32) -> (i32, i32) {
    %c0_i32 = arith.constant 0 : i32
    %c0_i32_0 = arith.constant 0 : i32
    %c0_i32_1 = arith.constant 0 : i32
    return %c0_i32, %c0_i32_0 : i32, i32
  }
  func.func @transform_9(%arg0: i32) -> (i32, i32) {
    %c0_i32 = arith.constant 0 : i32
    %c0_i32_0 = arith.constant 0 : i32
    %c0_i32_1 = arith.constant 0 : i32
    return %c0_i32, %c0_i32_0 : i32, i32
  }
  func.func @transform_10(%arg0: i32) -> (i32, i32) {
    %c0_i32 = arith.constant 0 : i32
    %c0_i32_0 = arith.constant 0 : i32
    %c0_i32_1 = arith.constant 0 : i32
    return %c0_i32, %c0_i32_0 : i32, i32
  }
  func.func @transform_11(%arg0: i32) -> (i32, i32, i32) {
    %c0_i32 = arith.constant 0 : i32
    %c0_i32_0 = arith.constant 0 : i32
    %c0_i32_1 = arith.constant 0 : i32
    %c0_i32_2 = arith.constant 0 : i32
    return %c0_i32, %c0_i32_0, %c0_i32_1 : i32, i32, i32
  }
}

</mosaic_0001>

<bundles_post_ra>
// kernel: transformer_encoder.1
= control target key start
LH: loop header
LB: loop body
LE: loop exit
PB: predicated region body
PF: predicated region fallthrough
CT: control target
= control target key end

     0   :  { %v3644_v2 = vmov 0   ;;  %s4589_s0 = inlined_call_operand.vmem [shape: f32[2,32,128], index: 0, kind: input, shape index: {}]   ;;  %s4590_s1 = inlined_call_operand.vmem [shape: bf16[128,384], index: 1, kind: input, shape index: {}]   ;;  %s4591_s2 = inlined_call_operand.vmem [shape: f32[1,384], index: 2, kind: input, shape index: {}]   ;;  %s4592_s3 = inlined_call_operand.vmem [shape: bf16[128,128], index: 3, kind: input, shape index: {}]   ;;  %s4593_s4 = inlined_call_operand.vmem [shape: f32[1,128], index: 4, kind: input, shape index: {}]   ;;  %s4594_s5 = inlined_call_operand.vmem [shape: f32[1,128], index: 5, kind: input, shape index: {}]   ;;  %s4595_s6 = inlined_call_operand.vmem [shape: f32[1,128], index: 6, kind: input, shape index: {}]   ;;  %s4596_s7 = inlined_call_operand.vmem [shape: bf16[128,256], index: 7, kind: input, shape index: {}]   ;;  %s4597_s8 = inlined_call_operand.vmem [shape: f32[1,256], index: 8, kind: input, shape index: {}]   ;;  %s4598_s9 = inlined_call_operand.vmem [shape: bf16[256,128], index: 9, kind: input, shape index: {}]   ;;  %s4599_s10 = inlined_call_operand.vmem [shape: f32[1,128], index: 10, kind: input, shape index: {}]   ;;  %s4600_s11 = inlined_call_operand.hbm [shape: f32[2,32,128], index: 11, kind: output, shape index: {}]  }
   0x1   :  { %v3374_v0 = vld [vmem:[%s4590_s1 + $0xac] ss:$12 sps:$4 sm:$0xff]   ;;  %v3376_v1 = vld [vmem:[%s4590_s1 + $0xa8] ss:$12 sps:$4 sm:$0xff]   ;;  %261 = vmatprep.mubr.bf16.mxu0 %v3644_v2  ;;  %v3379_v4 = vld [vmem:[%s4590_s1 + $0x90] ss:$12 sps:$4 sm:$0xff]  }
   0x2   :  { %229 = vmatprep.subr.bf16.mxu0 %v3374_v0  ;;  %v3377_v3 = vld [vmem:[%s4590_s1 + $0x94] ss:$12 sps:$4 sm:$0xff]   ;;  %v3380_v5 = vld [vmem:[%s4590_s1 + $0x7c] ss:$12 sps:$4 sm:$0xff]   ;;  %v3382_v6 = vld [vmem:[%s4590_s1 + $0x78] ss:$12 sps:$4 sm:$0xff]  }
   0x3   :  { %230 = vmatpush1.bf16.msra.mxu0 %v3376_v1  ;;  %v3383_v7 = vld [vmem:[%s4590_s1 + $0x64] ss:$12 sps:$4 sm:$0xff]   ;;  %v3385_v9 = vld [vmem:[%s4590_s1 + $0x60] ss:$12 sps:$4 sm:$0xff]   ;;  %v3388_v13 = vld [vmem:[%s4590_s1 + $0x48] ss:$12 sps:$4 sm:$0xff]  }
   0x4   :  { %231 = vmatprep.subr.bf16.mxu0 %v3377_v3  ;;  %v40_v8 = vld [vmem:[%s4589_s0] sm:$0xff]  ;;  %v41_v10 = vld [vmem:[%s4589_s0 + $0x8] sm:$0xff]  ;;  %v3398_v14 = vld [vmem:[%s4590_s1 + $0xb0] ss:$12 sps:$4 sm:$0xff]  }
   0x5   :  { %v3386_v11 = vld [vmem:[%s4590_s1 + $0x4c] ss:$12 sps:$4 sm:$0xff]   ;;  %v48_v12 = vpack.c.bf16 %v41_v10, %v40_v8  ;;  %v3389_v16 = vld [vmem:[%s4590_s1 + $0x34] ss:$12 sps:$4 sm:$0xff]   ;;  %3151 = vmatprep.subr.bf16.mxu1 %v3398_v14  ;;  %v3391_v18 = vld [vmem:[%s4590_s1 + $0x30] ss:$12 sps:$4 sm:$0xff]  }
   0x6   :  { %v3399_v15 = vld [vmem:[%s4590_s1 + $0x98] ss:$12 sps:$4 sm:$0xff]   ;;  %3152 = vmatpush3.bf16.msra.mxu1 %v3398_v14  ;;  %v3400_v17 = vld [vmem:[%s4590_s1 + $0x80] ss:$12 sps:$4 sm:$0xff]   ;;  %v3392_v19 = vld [vmem:[%s4590_s1 + $0x1c] ss:$12 sps:$4 sm:$0xff]  }
   0x7   :  { %232 = vmatpush1.bf16.msra.mxu0 %v3379_v4  ;;  %3167 = vmatprep.mubr.bf16.mxu1 %v48_v12  ;;  %v3394_v20 = vld [vmem:[%s4590_s1 + $0x18] ss:$12 sps:$4 sm:$0xff]   ;;  %v3401_v21 = vld [vmem:[%s4590_s1 + $0x68] ss:$12 sps:$4 sm:$0xff]   ;;  %v3402_v23 = vld [vmem:[%s4590_s1 + $0x50] ss:$12 sps:$4 sm:$0xff]  }
   0x8   :  { %233 = vmatprep.subr.bf16.mxu0 %v3380_v5  ;;  %3153 = vmatprep.subr.bf16.mxu1 %v3399_v15  ;;  %v3395_v22 = vld [vmem:[%s4590_s1 + $0x4] ss:$12 sps:$4 sm:$0xff]   ;;  %v3397_v24 = vld [vmem:[%s4590_s1] ss:$12 sps:$4 sm:$0xff]   ;;  %v43_v28 = vld [vmem:[%s4589_s0 + $0x18] sm:$0xff] }
   0x9   :  { %v3403_v25 = vld [vmem:[%s4590_s1 + $0x38] ss:$12 sps:$4 sm:$0xff]   ;;  %v3404_v26 = vld [vmem:[%s4590_s1 + $0x20] ss:$12 sps:$4 sm:$0xff]   ;;  %v42_v27 = vld [vmem:[%s4589_s0 + $0x10] sm:$0xff] }
   0xa   :  { %3154 = vmatpush3.bf16.msra.mxu1 %v3399_v15  ;;  %v3405_v29 = vld [vmem:[%s4590_s1 + $0x8] ss:$12 sps:$4 sm:$0xff]   ;;  %v49_v30 = vpack.c.bf16 %v43_v28, %v42_v27  ;;  %v44_v31 = vld [vmem:[%s4589_s0 + $0x20] sm:$0xff] }
   0xb   :  { %234 = vmatpush1.bf16.msra.mxu0 %v3382_v6  ;;  %3155 = vmatprep.subr.bf16.mxu1 %v3400_v17  ;;  %v45_v32 = vld [vmem:[%s4589_s0 + $0x28] sm:$0xff] }
   0xc   :  { %235 = vmatprep.subr.bf16.mxu0 %v3383_v7 }
   0xe   :  { %3156 = vmatpush3.bf16.msra.mxu1 %v3400_v17 }
   0xf   :  { %236 = vmatpush1.bf16.msra.mxu0 %v3385_v9  ;;  %3157 = vmatprep.subr.bf16.mxu1 %v3401_v21 }
  0x10   :  { %237 = vmatprep.subr.bf16.mxu0 %v3386_v11 }
  0x12   :  { %3158 = vmatpush3.bf16.msra.mxu1 %v3401_v21 }
  0x13   :  { %238 = vmatpush1.bf16.msra.mxu0 %v3388_v13  ;;  %3159 = vmatprep.subr.bf16.mxu1 %v3402_v23 }
  0x14   :  { %239 = vmatprep.subr.bf16.mxu0 %v3389_v16 }
  0x16   :  { %3160 = vmatpush3.bf16.msra.mxu1 %v3402_v23 }
  0x17   :  { %240 = vmatpush1.bf16.msra.mxu0 %v3391_v18  ;;  %3161 = vmatprep.subr.bf16.mxu1 %v3403_v25 }
  0x18   :  { %241 = vmatprep.subr.bf16.mxu0 %v3392_v19 }
  0x1a   :  { %3162 = vmatpush3.bf16.msra.mxu1 %v3403_v25 }
  0x1b   :  { %242 = vmatpush1.bf16.msra.mxu0 %v3394_v20  ;;  %3163 = vmatprep.subr.bf16.mxu1 %v3404_v26 }
  0x1c   :  { %243 = vmatprep.subr.bf16.mxu0 %v3395_v22 }
  0x1e   :  { %3164 = vmatpush3.bf16.msra.mxu1 %v3404_v26 }
  0x1f   :  { %244 = vmatpush1.bf16.msra.mxu0 %v3397_v24  ;;  %3165 = vmatprep.subr.bf16.mxu1 %v3405_v29 }
  0x22   :  { %262 = vmatmul.mubr.bf16.vlgmr.msra.gmra.mxu0 %v48_v12 }
  0x23   :  { %271 = vmatprep.mubr.bf16.mxu0 %v3644_v2 }
  0x2a   :  { %272 = vmatmul.mubr.bf16.gmra.mxu0 %v49_v30 }
  0x2b   :  { %281 = vmatprep.mubr.bf16.mxu0 %v3644_v2 }
  0x2c   :  { %16 = vsyncpa [#allocation3], 0  ;;  %3166 = vmatpush3.bf16.msra.mxu1 %v3405_v29  ;;  %v50_v33 = vpack.c.bf16 %v45_v32, %v44_v31  ;;  %v46_v34 = vld [vmem:[%s4589_s0 + $0x30] sm:$0xff]  ;;  %v47_v35 = vld [vmem:[%s4589_s0 + $0x38] sm:$0xff]  ;;  %v86_v37 = vlaneseq  ;;  %vm391_vm0 = vcmask 261120   ;;  %s3646_s25 = smov 64  }
  0x2d   :  { %v51_v36 = vpack.c.bf16 %v47_v35, %v46_v34  ;;  %v84_v40 = vld [vmem:[%s4591_s2] sm:$0x7]  ;;  %s3645_s2 = smov 96   ;;  %s3647_s15 = smov 32  }
  0x2e   :  { %v3811_v38 = vshrl.u32 %v86_v37, 7 }
  0x2f   :  { %3168 = vmatmul.mubr.bf16.vlgmr.msra.gmra.mxu1 %v49_v30 }
  0x30   :  { %3171 = vmatprep.mubr.bf16.mxu1 %v50_v33  ;;  %v88_v39 = vsub.s32 0, %v3811_v38  ;;  %v92_v50 = vsub.s32 1, %v3811_v38  ;;  %v96_v54 = vsub.s32 2, %v3811_v38 }
  0x32   :  { %282 = vmatmul.mubr.bf16.gmra.mxu0 %v50_v33  ;;  %v3819_v42 = vrot.slane %v84_v40, %v88_v39  ;;  %v93_v53 = vrot.slane %v84_v40, %v92_v50  ;;  %v97_v0 = vrot.slane %v84_v40, %v96_v54 }
  0x33   :  { %291 = vmatprep.mubr.bf16.mxu0 %v3644_v2 }
  0x37   :  { %3172 = vmatmul.mubr.bf16.gmra.mxu1 %v51_v36 }
  0x3a   :  { %292 = vmatmul.mubr.bf16.gmra.mxu0 %v51_v36 }
  0xe2   :  { %v263_v41 = vpop.f32.mrf.mxu0 }
  0xe3   :  { %v264_v45 = vadd.f32 %v263_v41, %v3819_v42 }
  0xe4   :  { %v265_v43 = vpop.f32.mrf.mxu0 }
  0xe5   :  { %v266_v62 = vadd.f32 %v265_v43, %v93_v53 }
  0xe6   :  { %v267_v44 = vpop.f32.mrf.mxu0 }
  0xe7   :  { %v268_v46 = vadd.f32 %v267_v44, %v3819_v42 }
  0xe8   :  { %v269_v47 = vpop.f32.mrf.mxu0 }
  0xe9   :  { %v3823_v48 = vpack.c.bf16 %v268_v46, %v264_v45  ;;  %v270_v57 = vadd.f32 %v269_v47, %v93_v53 }
  0xea   :  { %v273_v49 = vpop.f32.mrf.mxu0 }
  0xeb   :  { %3179 = vmatprep.mubr.msk.bf16.mxu1 %vm391_vm0, %v3823_v48  ;;  %v3833_v4 = vpack.c.bf16 %v270_v57, %v266_v62  ;;  %v274_v31 = vadd.f32 %v273_v49, %v3819_v42 }
  0xec   :  { %v275_v51 = vpop.f32.mrf.mxu0 }
  0xed   :  { %v276_v58 = vadd.f32 %v275_v51, %v93_v53  ;;  %v399_v21 = vsel %vm391_vm0, %v3833_v4, 0 }
  0xee   :  { %v277_v52 = vpop.f32.mrf.mxu0 }
  0xef   :  { %v3169_v56 = vpop.f32.mrf.mxu1  ;;  %v278_v22 = vadd.f32 %v277_v52, %v3819_v42 }
  0xf0   :  { %v279_v55 = vpop.f32.mrf.mxu0  ;;  %v345_v10 = vadd.f32 %v3169_v56, %v97_v0 }
  0xf1   :  { %v280_v59 = vadd.f32 %v279_v55, %v93_v53  ;;  %v336_v61 = vpop.f32.mrf.mxu1  ;;  %v3856_v35 = vpack.c.bf16 %v278_v22, %v274_v31 }
  0xf2   :  { %v283_v60 = vpop.f32.mrf.mxu0  ;;  %v337_v24 = vadd.f32 %v336_v61, %v97_v0 }
  0xf3   :  { %v3831_v63 = vpack.c.bf16 %v280_v59, %v276_v58  ;;  %v3170_v3 = vpop.f32.mrf.mxu1  ;;  %v284_v5 = vadd.f32 %v283_v60, %v3819_v42 }
  0xf4   :  { %v285_v1 = vpop.f32.mrf.mxu0  ;;  %v348_v11 = vadd.f32 %v3170_v3, %v97_v0 }
  0xf5   :  { %3351 = vmatprep.subr.msk.bf16.mxu1 %vm391_vm0, %v3831_v63  ;;  %v402_v6 = vsel %vm391_vm0, %v3831_v63, 0  ;;  %v339_v8 = vpop.f32.mrf.mxu1  ;;  %v286_v27 = vadd.f32 %v285_v1, %v93_v53 }
  0xf6   :  { %v287_v7 = vpop.f32.mrf.mxu0  ;;  %3176 = vmatpush3.bf16.xpose.msra.mxu1 %v402_v6  ;;  %v3847_v17 = vpack.c.bf16 %v348_v11, %v345_v10  ;;  %v340_v25 = vadd.f32 %v339_v8, %v97_v0 }
  0xf7   :  { %v288_v9 = vadd.f32 %v287_v7, %v3819_v42  ;;  %3352 = vmatprep.subr.msk.bf16.mxu1 %vm391_vm0, %v3833_v4  ;;  %v3173_v13 = vpop.f32.mrf.mxu1 }
  0xf8   :  { %v289_v12 = vpop.f32.mrf.mxu0  ;;  %v3858_v36 = vpack.c.bf16 %v340_v25, %v337_v24  ;;  %v361_v41 = vadd.f32 %v3173_v13, %v97_v0 }
  0xf9   :  { %v3843_v14 = vpack.c.bf16 %v288_v9, %v284_v5  ;;  %v352_v16 = vpop.f32.mrf.mxu1  ;;  %v290_v28 = vadd.f32 %v289_v12, %v93_v53 }
  0xfa   :  { %v293_v15 = vpop.f32.mrf.mxu0  ;;  %v353_v18 = vadd.f32 %v352_v16, %v97_v0 }
  0xfb   :  { %3187 = vmatprep.mubr.msk.bf16.mxu0 %vm391_vm0, %v3843_v14  ;;  %v3174_v20 = vpop.f32.mrf.mxu1  ;;  %v3860_v37 = vpack.c.bf16 %v290_v28, %v286_v27  ;;  %v294_v47 = vadd.f32 %v293_v15, %v3819_v42 }
  0xfc   :  { %v295_v19 = vpop.f32.mrf.mxu0  ;;  %v364_v43 = vadd.f32 %v3174_v20, %v97_v0 }
  0xfd   :  { %v355_v26 = vpop.f32.mrf.mxu1  ;;  %v296_v29 = vadd.f32 %v295_v19, %v93_v53  ;;  %v460_v46 = vsel %vm391_vm0, %v3860_v37, 0 }
  0xfe   :  { %v297_v23 = vpop.f32.mrf.mxu0  ;;  %3178 = vmatpush3.bf16.xpose.msra.mxu1 %v399_v21  ;;  %v356_v30 = vadd.f32 %v355_v26, %v97_v0  ;;  %v3874_v45 = vpack.c.bf16 %v364_v43, %v361_v41 }
  0xff   :  { %3191 = vmatprep.subr.bf16.mxu1 %v3847_v17  ;;  %v298_v49 = vadd.f32 %v297_v23, %v3819_v42 }
 0x100   :  { %v299_v32 = vpop.f32.mrf.mxu0  ;;  %v3854_v34 = vpack.c.bf16 %v356_v30, %v353_v18 }
 0x101   :  { %v300_v33 = vadd.f32 %v299_v32, %v93_v53  ;;  %v3882_v51 = vpack.c.bf16 %v298_v49, %v294_v47 }
 0x103   :  { %v3862_v40 = vpack.c.bf16 %v300_v33, %v296_v29 }
 0x105   :  { %3180 = vmatmul.mubr.msk.bf16.vlgmr.msra.gmra.mxu1 %vm391_vm0, %v3856_v35  ;;  %3353 = vmatprep.subr.msk.bf16.mxu0 %vm391_vm0, %v3862_v40  ;;  %v463_v44 = vsel %vm391_vm0, %v3862_v40, 0 }
 0x106   :  { %3184 = vmatpush3.bf16.xpose.msra.mxu0 %v463_v44  ;;  %3192 = vmatpush3.bf16.msra.mxu1 %v3847_v17 }
 0x107   :  { %3354 = vmatprep.subr.msk.bf16.mxu0 %vm391_vm0, %v3860_v37  ;;  %3193 = vmatprep.subr.bf16.mxu1 %v3858_v36 }
 0x10a   :  { %3194 = vmatpush3.bf16.msra.mxu1 %v3858_v36 }
 0x10b   :  { %3199 = vmatprep.subr.bf16.mxu1 %v3874_v45 }
 0x10e   :  { %3186 = vmatpush3.bf16.xpose.msra.mxu0 %v460_v46 }
 0x115   :  { %3188 = vmatmul.mubr.msk.bf16.vlgmr.msra.gmra.mxu0 %vm391_vm0, %v3882_v51 }
 0x1c5   :  { %v3181_v52 = vpop.f32.mrf.mxu1 }
 0x1c6   :  { %v516_v53 = vmul.f32 0.17677669, %v3181_v52 }
 0x1c7   :  { %v438_v54 = vpop.f32.mrf.mxu1 }
 0x1c8   :  { %v514_v55 = vmul.f32 0.17677669, %v438_v54  ;;  %v528_v56 = vsel %vm391_vm0, %v516_v53, -inf }
 0x1c9   :  { %529 = vmax.xlane.f32.xlu1 %v528_v56  ;;  %v3182_v57 = vpop.f32.mrf.mxu1 }
 0x1ca   :  { %v517_v58 = vmul.f32 0.17677669, %v3182_v57  ;;  %v522_v59 = vsel %vm391_vm0, %v514_v55, -inf }
 0x1cb   :  { %523 = vmax.xlane.f32.xlu0 %v522_v59  ;;  %v441_v60 = vpop.f32.mrf.mxu1 }
 0x1cc   :  { %v515_v42 = vmul.f32 0.17677669, %v441_v60  ;;  %v531_v61 = vsel %vm391_vm0, %v517_v58, -inf }
 0x1cd   :  { %532 = vmax.xlane.f32.xlu1 %v531_v61 }
 0x1ce   :  { %v525_v62 = vsel %vm391_vm0, %v515_v42, -inf }
 0x1cf   :  { %526 = vmax.xlane.f32.xlu0 %v525_v62 }
 0x1d5   :  { %v3189_v0 = vpop.f32.mrf.mxu0 }
 0x1d6   :  { %v520_v3 = vmul.f32 0.17677669, %v3189_v0 }
 0x1d7   :  { %v499_v1 = vpop.f32.mrf.mxu0 }
 0x1d8   :  { %v518_v5 = vmul.f32 0.17677669, %v499_v1  ;;  %v540_v10 = vsel %vm391_vm0, %v520_v3, -inf }
 0x1d9   :  { %v3190_v6 = vpop.f32.mrf.mxu0 }
 0x1da   :  { %v534_v7 = vsel %vm391_vm0, %v518_v5, -inf  ;;  %v521_v11 = vmul.f32 0.17677669, %v3190_v6 }
 0x1db   :  { %v502_v8 = vpop.f32.mrf.mxu0  ;;  %535 = vmax.xlane.f32.xlu0 %v534_v7 }
 0x1dc   :  { %v519_v9 = vmul.f32 0.17677669, %v502_v8  ;;  %v543_v13 = vsel %vm391_vm0, %v521_v11, -inf }
 0x1de   :  { %v537_v12 = vsel %vm391_vm0, %v519_v9, -inf }
 0x1df   :  { %538 = vmax.xlane.f32.xlu1 %v537_v12  ;;  %541 = vmax.xlane.f32.xlu0 %v540_v10 }
 0x1e3   :  { %544 = vmax.xlane.f32.xlu1 %v543_v13 }
 0x252   :  { %v530_v15 = vpop.xlane.xlu1 %529 }
 0x253   :  { %v548_v16 = vsub.f32 %v516_v53, %v530_v15 }
 0x254   :  { %v524_v18 = vpop.xlane.xlu0 %523 }
 0x255   :  { %v558_v19 = vmul.f32 1.442695, %v548_v16  ;;  %v546_v20 = vsub.f32 %v514_v55, %v524_v18 }
 0x256   :  { %v533_v21 = vpop.xlane.xlu1 %532 }
 0x257   :  { %3454 = vpow2.f32 %v558_v19  ;;  %v554_v22 = vmul.f32 1.442695, %v546_v20  ;;  %v549_v23 = vsub.f32 %v517_v58, %v533_v21 }
 0x258   :  { %v527_v24 = vpop.xlane.xlu0 %526 }
 0x259   :  { %3456 = vpow2.f32 %v554_v22  ;;  %v560_v25 = vmul.f32 1.442695, %v549_v23  ;;  %v547_v26 = vsub.f32 %v515_v42, %v527_v24 }
 0x25b   :  { %3458 = vpow2.f32 %v560_v25  ;;  %v556_v27 = vmul.f32 1.442695, %v547_v26 }
 0x25d   :  { %3460 = vpow2.f32 %v556_v27 }
 0x264   :  { %v3894_v28 = vpop.eup %3454  ;;  %v536_v29 = vpop.xlane.xlu0 %535 }
 0x265   :  { %v576_v30 = vsel %vm391_vm0, %v3894_v28, 0.0  ;;  %v550_v33 = vsub.f32 %v518_v5, %v536_v29 }
 0x266   :  { %v3457_v31 = vpop.eup %3456  ;;  %577 = vadd.xlane.f32.xlu0 %v576_v30 }
 0x267   :  { %v570_v46 = vsel %vm391_vm0, %v3457_v31, 0.0  ;;  %v562_v52 = vmul.f32 1.442695, %v550_v33 }
 0x268   :  { %v3459_v32 = vpop.eup %3458  ;;  %v542_v41 = vpop.xlane.xlu0 %541 }
 0x269   :  { %v552_v43 = vsub.f32 %v520_v3, %v542_v41  ;;  %v579_v44 = vsel %vm391_vm0, %v3459_v32, 0.0  ;;  %v539_v58 = vpop.xlane.xlu1 %538 }
 0x26a   :  { %v3461_v47 = vpop.eup %3460  ;;  %580 = vadd.xlane.f32.xlu1 %v579_v44  ;;  %571 = vadd.xlane.f32.xlu0 %v570_v46  ;;  %v551_v42 = vsub.f32 %v519_v9, %v539_v58 }
 0x26b   :  { %v566_v49 = vmul.f32 1.442695, %v552_v43  ;;  %v573_v53 = vsel %vm391_vm0, %v3461_v47, 0.0 }
 0x26c   :  { %v564_v62 = vmul.f32 1.442695, %v551_v42 }
 0x26d   :  { %3462 = vpow2.f32 %v566_v49  ;;  %v545_v59 = vpop.xlane.xlu1 %544 }
 0x26e   :  { %574 = vadd.xlane.f32.xlu1 %v573_v53  ;;  %3464 = vpow2.f32 %v562_v52  ;;  %v553_v60 = vsub.f32 %v521_v11, %v545_v59 }
 0x270   :  { %v568_v61 = vmul.f32 1.442695, %v553_v60 }
 0x272   :  { %3466 = vpow2.f32 %v568_v61 }
 0x273   :  { %3468 = vpow2.f32 %v564_v62 }
 0x27a   :  { %v3901_v54 = vpop.eup %3462 }
 0x27b   :  { %v588_v55 = vsel %vm391_vm0, %v3901_v54, 0.0  ;;  %v3905_v56 = vpop.eup %3464 }
 0x27c   :  { %589 = vadd.xlane.f32.xlu0 %v588_v55  ;;  %v582_v57 = vsel %vm391_vm0, %v3905_v56, 0.0 }
 0x27f   :  { %740 = vrot.lane.b32.xlu1 %v3833_v4, %s3645_s2  ;;  %v3467_v0 = vpop.eup %3466 }
 0x280   :  { %583 = vadd.xlane.f32.xlu0 %v582_v57  ;;  %v591_v1 = vsel %vm391_vm0, %v3467_v0, 0.0  ;;  %v3469_v3 = vpop.eup %3468 }
 0x281   :  { %v585_v5 = vsel %vm391_vm0, %v3469_v3, 0.0 }
 0x283   :  { %815 = vrot.lane.b32.xlu1 %v3862_v40, %s3645_s2 }
 0x296   :  { %742 = vrot.lane.b32.xlu0 %v3831_v63, %s3645_s2 }
 0x29a   :  { %736 = vrot.lane.b32.xlu0 %v3856_v35, %s3645_s2 }
 0x29e   :  { %807 = vrot.lane.b32.xlu0 %v3843_v14, %s3645_s2 }
 0x2a7   :  { %592 = vadd.xlane.f32.xlu1 %v591_v1 }
 0x2ab   :  { %586 = vadd.xlane.f32.xlu1 %v585_v5 }
 0x2bc   :  { %734 = vrot.lane.b32.xlu1 %v3823_v48, %s3645_s2 }
 0x2c0   :  { %813 = vrot.lane.b32.xlu1 %v3860_v37, %s3645_s2 }
 0x2c4   :  { %809 = vrot.lane.b32.xlu1 %v3882_v51, %s3645_s2 }
 0x2ef   :  { %v578_v6 = vpop.xlane.xlu0 %577 }
 0x2f3   :  { %v581_v7 = vpop.xlane.xlu1 %580  ;;  %v572_v8 = vpop.xlane.xlu0 %571 }
 0x2f4   :  { %3470 = vrcp.f32 %v581_v7 }
 0x2f5   :  { %3472 = vrcp.f32 %v572_v8 }
 0x2f6   :  { %3474 = vrcp.f32 %v578_v6 }
 0x2f7   :  { %v575_v9 = vpop.xlane.xlu1 %574 }
 0x2f8   :  { %3476 = vrcp.f32 %v575_v9 }
 0x2fb   :  { %v741_v23 = vpop.permute.xlu1 %740 }
 0x2ff   :  { %v816_v27 = vpop.permute.xlu1 %815 }
 0x300   :  { %v827_v58 = vsel %vm391_vm0, %v816_v27, 0 }
 0x301   :  { %v3471_v10 = vpop.eup %3470 }
 0x302   :  { %v3473_v11 = vpop.eup %3472  ;;  %v601_v15 = vmul.f32 %v3471_v10, %v3459_v32 }
 0x303   :  { %v3475_v12 = vpop.eup %3474  ;;  %v595_v18 = vmul.f32 %v3473_v11, %v3457_v31 }
 0x304   :  { %v599_v20 = vmul.f32 %v3475_v12, %v3894_v28  ;;  %v751_v28 = vsel %vm391_vm0, %v741_v23, 0 }
 0x305   :  { %v3477_v13 = vpop.eup %3476  ;;  %v590_v16 = vpop.xlane.xlu0 %589 }
 0x306   :  { %v597_v19 = vmul.f32 %v3477_v13, %v3461_v47  ;;  %v611_v22 = vpack.c.bf16 %v601_v15, %v599_v20 }
 0x308   :  { %v610_v21 = vpack.c.bf16 %v597_v19, %v595_v18 }
 0x309   :  { %v584_v24 = vpop.xlane.xlu0 %583 }
 0x30a   :  { %3195 = vmatprep.mubr.msk.bf16.mxu1 %vm391_vm0, %v610_v21 }
 0x30b   :  { %3196 = vmatmul.mubr.msk.bf16.vlgmr.msra.gmra.mxu1 %vm391_vm0, %v611_v22 }
 0x30c   :  { %3200 = vmatpush3.bf16.msra.mxu1 %v3874_v45 }
 0x30d   :  { %3201 = vmatprep.subr.bf16.mxu1 %v3854_v34  ;;  %v743_v25 = vpop.permute.xlu0 %742 }
 0x30e   :  { %3355 = vmatprep.subr.msk.bf16.mxu0 %vm391_vm0, %v743_v25  ;;  %v754_v26 = vsel %vm391_vm0, %v743_v25, 0 }
 0x30f   :  { %3208 = vmatpush3.bf16.xpose.msra.mxu0 %v754_v26 }
 0x310   :  { %3202 = vmatpush3.bf16.msra.mxu1 %v3854_v34  ;;  %3356 = vmatprep.subr.msk.bf16.mxu0 %vm391_vm0, %v741_v23 }
 0x311   :  { %3357 = vmatprep.subr.msk.bf16.mxu1 %vm391_vm0, %v816_v27  ;;  %v737_v32 = vpop.permute.xlu0 %736 }
 0x315   :  { %v808_v57 = vpop.permute.xlu0 %807 }
 0x317   :  { %3210 = vmatpush3.bf16.xpose.msra.mxu0 %v751_v28 }
 0x330   :  { %v593_v29 = vpop.xlane.xlu1 %592 }
 0x331   :  { %3478 = vrcp.f32 %v593_v29 }
 0x332   :  { %3480 = vrcp.f32 %v584_v24 }
 0x333   :  { %3482 = vrcp.f32 %v590_v16 }
 0x334   :  { %v587_v30 = vpop.xlane.xlu1 %586 }
 0x335   :  { %3484 = vrcp.f32 %v587_v30 }
 0x338   :  { %v735_v31 = vpop.permute.xlu1 %734 }
 0x339   :  { %3211 = vmatprep.mubr.msk.bf16.mxu0 %vm391_vm0, %v735_v31 }
 0x33a   :  { %3212 = vmatmul.mubr.msk.bf16.vlgmr.msra.gmra.mxu0 %vm391_vm0, %v737_v32 }
 0x33c   :  { %v814_v59 = vpop.permute.xlu1 %813 }
 0x33e   :  { %v3479_v33 = vpop.eup %3478 }
 0x33f   :  { %v3481_v41 = vpop.eup %3480  ;;  %v609_v46 = vmul.f32 %v3479_v33, %v3467_v0 }
 0x340   :  { %v3483_v43 = vpop.eup %3482  ;;  %v603_v47 = vmul.f32 %v3481_v41, %v3905_v56  ;;  %v824_v56 = vsel %vm391_vm0, %v814_v59, 0  ;;  %v810_v60 = vpop.permute.xlu1 %809 }
 0x341   :  { %v607_v52 = vmul.f32 %v3483_v43, %v3901_v54 }
 0x342   :  { %v3485_v44 = vpop.eup %3484 }
 0x343   :  { %v605_v49 = vmul.f32 %v3485_v44, %v3469_v3  ;;  %v613_v55 = vpack.c.bf16 %v609_v46, %v607_v52 }
 0x345   :  { %v612_v53 = vpack.c.bf16 %v605_v49, %v603_v47 }
 0x347   :  { %3203 = vmatprep.mubr.msk.bf16.mxu1 %vm391_vm0, %v612_v53 }
 0x348   :  { %3204 = vmatmul.mubr.msk.bf16.vlgmr.msra.gmra.mxu1 %vm391_vm0, %v613_v55 }
 0x349   :  { %3216 = vmatpush3.bf16.xpose.msra.mxu1 %v827_v58  ;;  %3219 = vmatprep.mubr.msk.bf16.mxu1 %vm391_vm0, %v808_v57 }
 0x34a   :  { %3358 = vmatprep.subr.msk.bf16.mxu1 %vm391_vm0, %v814_v59 }
 0x351   :  { %3218 = vmatpush3.bf16.xpose.msra.mxu1 %v824_v56 }
 0x358   :  { %3220 = vmatmul.mubr.msk.bf16.vlgmr.msra.gmra.mxu1 %vm391_vm0, %v810_v60 }
 0x3cb   :  { %v3949_v54 = vpop.f32.mrf.mxu1 }
 0x3cd   :  { %v3951_v42 = vpop.f32.mrf.mxu1 }
 0x3cf   :  { %v3953_v61 = vpop.f32.mrf.mxu1 }
 0x3d0   :  { %v729_v62 = vpack.c.bf16 %v3953_v61, %v3949_v54 }
 0x3d1   :  { %v3957_v0 = vpop.f32.mrf.mxu1 }
 0x3d2   :  { %v728_v1 = vpack.c.bf16 %v3957_v0, %v3951_v42 }
 0x3fa   :  { %v3213_v3 = vpop.f32.mrf.mxu0 }
 0x3fb   :  { %v880_v8 = vmul.f32 0.17677669, %v3213_v3 }
 0x3fc   :  { %v790_v5 = vpop.f32.mrf.mxu0 }
 0x3fd   :  { %v878_v6 = vmul.f32 0.17677669, %v790_v5  ;;  %v892_v13 = vsel %vm391_vm0, %v880_v8, -inf }
 0x3fe   :  { %v3214_v7 = vpop.f32.mrf.mxu0 }
 0x3ff   :  { %v886_v9 = vsel %vm391_vm0, %v878_v6, -inf  ;;  %v881_v12 = vmul.f32 0.17677669, %v3214_v7 }
 0x400   :  { %887 = vmax.xlane.f32.xlu0 %v886_v9  ;;  %v793_v10 = vpop.f32.mrf.mxu0 }
 0x401   :  { %v879_v11 = vmul.f32 0.17677669, %v793_v10  ;;  %v895_v16 = vsel %vm391_vm0, %v881_v12, -inf }
 0x403   :  { %v889_v15 = vsel %vm391_vm0, %v879_v11, -inf }
 0x404   :  { %893 = vmax.xlane.f32.xlu0 %v892_v13  ;;  %890 = vmax.xlane.f32.xlu1 %v889_v15 }
 0x408   :  { %v3965_v18 = vpop.f32.mrf.mxu1  ;;  %896 = vmax.xlane.f32.xlu0 %v895_v16 }
 0x40a   :  { %v3967_v19 = vpop.f32.mrf.mxu1 }
 0x40c   :  { %v3969_v20 = vpop.f32.mrf.mxu1 }
 0x40d   :  { %v731_v21 = vpack.c.bf16 %v3969_v20, %v3965_v18 }
 0x40e   :  { %v3973_v22 = vpop.f32.mrf.mxu1 }
 0x40f   :  { %v730_v23 = vpack.c.bf16 %v3973_v22, %v3967_v19 }
 0x418   :  { %v3221_v24 = vpop.f32.mrf.mxu1 }
 0x419   :  { %v884_v28 = vmul.f32 0.17677669, %v3221_v24 }
 0x41a   :  { %v863_v25 = vpop.f32.mrf.mxu1 }
 0x41b   :  { %v882_v26 = vmul.f32 0.17677669, %v863_v25  ;;  %v904_v33 = vsel %vm391_vm0, %v884_v28, -inf }
 0x41c   :  { %v3222_v27 = vpop.f32.mrf.mxu1 }
 0x41d   :  { %v898_v29 = vsel %vm391_vm0, %v882_v26, -inf  ;;  %v885_v32 = vmul.f32 0.17677669, %v3222_v27 }
 0x41e   :  { %899 = vmax.xlane.f32.xlu0 %v898_v29  ;;  %v866_v30 = vpop.f32.mrf.mxu1 }
 0x41f   :  { %v883_v31 = vmul.f32 0.17677669, %v866_v30  ;;  %v907_v43 = vsel %vm391_vm0, %v885_v32, -inf }
 0x421   :  { %v901_v41 = vsel %vm391_vm0, %v883_v31, -inf }
 0x422   :  { %905 = vmax.xlane.f32.xlu0 %v904_v33  ;;  %902 = vmax.xlane.f32.xlu1 %v901_v41 }
 0x426   :  { %908 = vmax.xlane.f32.xlu1 %v907_v43 }
 0x489   :  { %v888_v44 = vpop.xlane.xlu0 %887 }
 0x48a   :  { %v910_v46 = vsub.f32 %v878_v6, %v888_v44 }
 0x48c   :  { %v918_v47 = vmul.f32 1.442695, %v910_v46 }
 0x48d   :  { %v891_v49 = vpop.xlane.xlu1 %890  ;;  %v894_v52 = vpop.xlane.xlu0 %893 }
 0x48e   :  { %3486 = vpow2.f32 %v918_v47  ;;  %v911_v53 = vsub.f32 %v879_v11, %v891_v49  ;;  %v912_v55 = vsub.f32 %v880_v8, %v894_v52 }
 0x490   :  { %v920_v57 = vmul.f32 1.442695, %v911_v53  ;;  %v922_v58 = vmul.f32 1.442695, %v912_v55 }
 0x491   :  { %v897_v59 = vpop.xlane.xlu0 %896 }
 0x492   :  { %3488 = vpow2.f32 %v920_v57  ;;  %v913_v56 = vsub.f32 %v881_v12, %v897_v59 }
 0x493   :  { %3490 = vpow2.f32 %v922_v58 }
 0x494   :  { %v924_v60 = vmul.f32 1.442695, %v913_v56 }
 0x496   :  { %3492 = vpow2.f32 %v924_v60 }
 0x49b   :  { %v3981_v3 = vpop.eup %3486 }
 0x49c   :  { %v934_v5 = vsel %vm391_vm0, %v3981_v3, 0.0 }
 0x49d   :  { %935 = vadd.xlane.f32.xlu0 %v934_v5 }
 0x49f   :  { %v3489_v6 = vpop.eup %3488 }
 0x4a0   :  { %v3985_v7 = vpop.eup %3490  ;;  %v937_v9 = vsel %vm391_vm0, %v3489_v6, 0.0 }
 0x4a1   :  { %938 = vadd.xlane.f32.xlu1 %v937_v9  ;;  %v940_v8 = vsel %vm391_vm0, %v3985_v7, 0.0 }
 0x4a2   :  { %941 = vadd.xlane.f32.xlu0 %v940_v8 }
 0x4a3   :  { %v3990_v10 = vpop.eup %3492 }
 0x4a4   :  { %v943_v11 = vsel %vm391_vm0, %v3990_v10, 0.0 }
 0x4a5   :  { %944 = vadd.xlane.f32.xlu1 %v943_v11 }
 0x4a7   :  { %v900_v12 = vpop.xlane.xlu0 %899 }
 0x4a8   :  { %v914_v13 = vsub.f32 %v882_v26, %v900_v12 }
 0x4aa   :  { %v926_v25 = vmul.f32 1.442695, %v914_v13 }
 0x4ab   :  { %v906_v15 = vpop.xlane.xlu0 %905  ;;  %v903_v27 = vpop.xlane.xlu1 %902 }
 0x4ac   :  { %v916_v16 = vsub.f32 %v884_v28, %v906_v15  ;;  %v915_v43 = vsub.f32 %v883_v31, %v903_v27  ;;  %v3407_v27 = vld [vmem:[%s4592_s3 + $0x10] sm:$0xff]  }
 0x4ae   :  { %v930_v24 = vmul.f32 1.442695, %v916_v16  ;;  %v928_v46 = vmul.f32 1.442695, %v915_v43 }
 0x4af   :  { %v909_v26 = vpop.xlane.xlu1 %908 }
 0x4b0   :  { %3494 = vpow2.f32 %v930_v24  ;;  %v917_v41 = vsub.f32 %v885_v32, %v909_v26  ;;  %v3408_v26 = vld [vmem:[%s4592_s3 + $0x8] sm:$0xff]  }
 0x4b1   :  { %3496 = vpow2.f32 %v926_v25 }
 0x4b2   :  { %v932_v44 = vmul.f32 1.442695, %v917_v41 }
 0x4b4   :  { %3498 = vpow2.f32 %v932_v44 }
 0x4b5   :  { %3500 = vpow2.f32 %v928_v46 }
 0x4b6   :  { %980 = vrot.lane.b32.xlu1 %v3858_v36, %s3645_s2 }
 0x4ba   :  { %1045 = vrot.lane.b32.xlu1 %v3874_v45, %s3645_s2 }
 0x4bd   :  { %v3998_v29 = vpop.eup %3494 }
 0x4be   :  { %v952_v30 = vsel %vm391_vm0, %v3998_v29, 0.0  ;;  %v4002_v33 = vpop.eup %3496 }
 0x4bf   :  { %953 = vadd.xlane.f32.xlu0 %v952_v30  ;;  %v946_v28 = vsel %vm391_vm0, %v4002_v33, 0.0 }
 0x4c1   :  { %v4006_v47 = vpop.eup %3498 }
 0x4c2   :  { %v955_v49 = vsel %vm391_vm0, %v4006_v47, 0.0  ;;  %v4012_v52 = vpop.eup %3500 }
 0x4c3   :  { %947 = vadd.xlane.f32.xlu0 %v946_v28  ;;  %v949_v31 = vsel %vm391_vm0, %v4012_v52, 0.0 }
 0x4d9   :  { %982 = vrot.lane.b32.xlu0 %v3847_v17, %s3645_s2 }
 0x4dd   :  { %1292 = vrot.lane.b32.xlu0 %v3831_v63, %s3646_s25 }
 0x4de   :  { %956 = vadd.xlane.f32.xlu1 %v955_v49 }
 0x4e1   :  { %1361 = vrot.lane.b32.xlu0 %v3862_v40, %s3646_s25 }
 0x4e2   :  { %950 = vadd.xlane.f32.xlu1 %v949_v31 }
 0x4e5   :  { %1288 = vrot.lane.b32.xlu0 %v3856_v35, %s3646_s25 }
 0x4e9   :  { %1355 = vrot.lane.b32.xlu0 %v3843_v14, %s3646_s25 }
 0x4f3   :  { %1043 = vrot.lane.b32.xlu1 %v3854_v34, %s3645_s2 }
 0x4f7   :  { %1290 = vrot.lane.b32.xlu1 %v3833_v4, %s3646_s25 }
 0x4fb   :  { %1286 = vrot.lane.b32.xlu1 %v3823_v48, %s3646_s25 }
 0x4ff   :  { %1359 = vrot.lane.b32.xlu1 %v3860_v37, %s3646_s25 }
 0x503   :  { %1357 = vrot.lane.b32.xlu1 %v3882_v51, %s3646_s25 }
 0x526   :  { %v936_v32 = vpop.xlane.xlu0 %935 }
 0x527   :  { %3502 = vrcp.f32 %v936_v32 }
 0x52a   :  { %v939_v53 = vpop.xlane.xlu1 %938 }
 0x52b   :  { %3504 = vrcp.f32 %v939_v53  ;;  %v942_v8 = vpop.xlane.xlu0 %941 }
 0x52e   :  { %v945_v55 = vpop.xlane.xlu1 %944 }
 0x52f   :  { %3506 = vrcp.f32 %v945_v55 }
 0x530   :  { %3508 = vrcp.f32 %v942_v8 }
 0x532   :  { %v981_v57 = vpop.permute.xlu1 %980 }
 0x534   :  { %v3503_v58 = vpop.eup %3502 }
 0x535   :  { %v959_v60 = vmul.f32 %v3503_v58, %v3981_v3  ;;  %v3406_v3 = vld [vmem:[%s4592_s3 + $0x18] sm:$0xff]  }
 0x536   :  { %v1046_v59 = vpop.permute.xlu1 %1045 }
 0x537   :  { %3231 = vmatprep.subr.bf16.mxu1 %v1046_v59 }
 0x538   :  { %v3505_v56 = vpop.eup %3504  ;;  %3232 = vmatpush3.bf16.msra.mxu1 %v1046_v59  ;;  %v3409_v59 = vld [vmem:[%s4592_s3] sm:$0xff]  }
 0x539   :  { %v961_v5 = vmul.f32 %v3505_v56, %v3489_v6 }
 0x53b   :  { %v974_v9 = vpack.c.bf16 %v961_v5, %v959_v60 }
 0x53c   :  { %v3507_v13 = vpop.eup %3506 }
 0x53d   :  { %3227 = vmatprep.mubr.msk.bf16.mxu0 %vm391_vm0, %v974_v9  ;;  %v3509_v16 = vpop.eup %3508  ;;  %v965_v24 = vmul.f32 %v3507_v13, %v3990_v10 }
 0x53e   :  { %v963_v6 = vmul.f32 %v3509_v16, %v3985_v7 }
 0x540   :  { %v975_v25 = vpack.c.bf16 %v965_v24, %v963_v6 }
 0x548   :  { %v954_v11 = vpop.xlane.xlu0 %953 }
 0x54c   :  { %v948_v12 = vpop.xlane.xlu0 %947 }
 0x550   :  { %v983_v15 = vpop.permute.xlu0 %982 }
 0x551   :  { %3223 = vmatprep.subr.bf16.mxu0 %v983_v15 }
 0x552   :  { %3224 = vmatpush3.bf16.msra.mxu0 %v983_v15 }
 0x553   :  { %3225 = vmatprep.subr.bf16.mxu0 %v981_v57 }
 0x554   :  { %v1293_v30 = vpop.permute.xlu0 %1292 }
 0x555   :  { %v1304_v60 = vsel %vm391_vm0, %v1293_v30, 0 }
 0x556   :  { %3226 = vmatpush3.bf16.msra.mxu0 %v981_v57 }
 0x557   :  { %3239 = vmatprep.subr.bf16.mxu0 %v3406_v3 }
 0x559   :  { %3228 = vmatmul.mubr.msk.bf16.vlgmr.msra.gmra.mxu0 %vm391_vm0, %v975_v25 }
 0x55a   :  { %3240 = vmatpush3.bf16.msra.mxu0 %v3406_v3 }
 0x55b   :  { %3241 = vmatprep.subr.bf16.mxu0 %v3407_v27 }
 0x55e   :  { %3242 = vmatpush3.bf16.msra.mxu0 %v3407_v27 }
 0x55f   :  { %3359 = vmatprep.subr.msk.bf16.mxu0 %vm391_vm0, %v1293_v30 }
 0x567   :  { %v957_v10 = vpop.xlane.xlu1 %956 }
 0x568   :  { %3510 = vrcp.f32 %v957_v10 }
 0x569   :  { %3512 = vrcp.f32 %v948_v12 }
 0x56a   :  { %3514 = vrcp.f32 %v954_v11 }
 0x56b   :  { %v951_v7 = vpop.xlane.xlu1 %950 }
 0x56c   :  { %3516 = vrcp.f32 %v951_v7 }
 0x56f   :  { %v1044_v28 = vpop.permute.xlu1 %1043 }
 0x570   :  { %3233 = vmatprep.subr.bf16.mxu1 %v1044_v28 }
 0x571   :  { %3234 = vmatpush3.bf16.msra.mxu1 %v1044_v28 }
 0x572   :  { %3251 = vmatprep.subr.bf16.mxu1 %v3408_v26 }
 0x573   :  { %v1291_v55 = vpop.permute.xlu1 %1290 }
 0x574   :  { %v1301_v18 = vsel %vm391_vm0, %v1291_v55, 0 }
 0x575   :  { %v3511_v41 = vpop.eup %3510 }
 0x576   :  { %v3513_v43 = vpop.eup %3512  ;;  %v973_v49 = vmul.f32 %v3511_v41, %v4006_v47 }
 0x577   :  { %v3515_v44 = vpop.eup %3514  ;;  %v967_v31 = vmul.f32 %v3513_v43, %v4002_v33  ;;  %v1287_v33 = vpop.permute.xlu1 %1286 }
 0x578   :  { %v971_v53 = vmul.f32 %v3515_v44, %v3998_v29  ;;  %v1362_v29 = vpop.permute.xlu0 %1361 }
 0x579   :  { %v3517_v46 = vpop.eup %3516  ;;  %v1373_v47 = vsel %vm391_vm0, %v1362_v29, 0 }
 0x57a   :  { %v969_v32 = vmul.f32 %v3517_v46, %v4012_v52  ;;  %v977_v58 = vpack.c.bf16 %v973_v49, %v971_v53 }
 0x57b   :  { %v1360_v52 = vpop.permute.xlu1 %1359 }
 0x57c   :  { %v976_v57 = vpack.c.bf16 %v969_v32, %v967_v31  ;;  %v1289_v42 = vpop.permute.xlu0 %1288 }
 0x57e   :  { %3235 = vmatprep.mubr.msk.bf16.mxu1 %vm391_vm0, %v976_v57 }
 0x57f   :  { %3236 = vmatmul.mubr.msk.bf16.vlgmr.msra.gmra.mxu1 %vm391_vm0, %v977_v58  ;;  %v1358_v54 = vpop.permute.xlu1 %1357 }
 0x580   :  { %3252 = vmatpush3.bf16.msra.mxu1 %v3408_v26  ;;  %3255 = vmatprep.mubr.msk.bf16.mxu1 %vm391_vm0, %v728_v1  ;;  %v1356_v0 = vpop.permute.xlu0 %1355  ;;  %v1370_v1 = vsel %vm391_vm0, %v1360_v52, 0 }
 0x581   :  { %3253 = vmatprep.subr.bf16.mxu1 %v3409_v59 }
 0x584   :  { %3254 = vmatpush3.bf16.msra.mxu1 %v3409_v59 }
 0x585   :  { %3361 = vmatprep.subr.msk.bf16.mxu1 %vm391_vm0, %v1362_v29 }
 0x587   :  { %3256 = vmatmul.mubr.msk.bf16.vlgmr.msra.gmra.mxu1 %vm391_vm0, %v729_v62 }
 0x588   :  { %3272 = vmatpush3.bf16.xpose.msra.mxu1 %v1373_v47  ;;  %3259 = vmatprep.mubr.msk.bf16.mxu1 %vm391_vm0, %v730_v23 }
 0x589   :  { %3362 = vmatprep.subr.msk.bf16.mxu1 %vm391_vm0, %v1360_v52 }
 0x58f   :  { %3260 = vmatmul.mubr.msk.bf16.gmra.mxu1 %vm391_vm0, %v731_v21 }
 0x590   :  { %3274 = vmatpush3.bf16.xpose.msra.mxu1 %v1370_v1  ;;  %3275 = vmatprep.mubr.msk.bf16.mxu1 %vm391_vm0, %v1356_v0 }
 0x597   :  { %3276 = vmatmul.mubr.msk.bf16.vlgmr.msra.gmra.mxu1 %vm391_vm0, %v1358_v54 }
 0x619   :  { %v3229_v61 = vpop.f32.mrf.mxu0 }
 0x61b   :  { %v1026_v62 = vpop.f32.mrf.mxu0 }
 0x61d   :  { %v3230_v19 = vpop.f32.mrf.mxu0 }
 0x61e   :  { %v1105_v56 = vpack.c.bf16 %v3230_v19, %v3229_v61 }
 0x61f   :  { %v1029_v22 = vpop.f32.mrf.mxu0 }
 0x620   :  { %v1104_v23 = vpack.c.bf16 %v1029_v22, %v1026_v62 }
 0x622   :  { %3243 = vmatprep.mubr.msk.bf16.mxu0 %vm391_vm0, %v1104_v23 }
 0x623   :  { %3244 = vmatmul.mubr.msk.bf16.vlgmr.msra.gmra.mxu0 %vm391_vm0, %v1105_v56 }
 0x624   :  { %3264 = vmatpush3.bf16.xpose.msra.mxu0 %v1304_v60 }
 0x625   :  { %3360 = vmatprep.subr.msk.bf16.mxu0 %vm391_vm0, %v1291_v55 }
 0x62c   :  { %3266 = vmatpush3.bf16.xpose.msra.mxu0 %v1301_v18 }
 0x63f   :  { %v3237_v20 = vpop.f32.mrf.mxu1 }
 0x641   :  { %v1089_v21 = vpop.f32.mrf.mxu1 }
 0x643   :  { %v3238_v5 = vpop.f32.mrf.mxu1 }
 0x644   :  { %v1107_v11 = vpack.c.bf16 %v3238_v5, %v3237_v20 }
 0x645   :  { %v1092_v9 = vpop.f32.mrf.mxu1 }
 0x646   :  { %v1106_v8 = vpack.c.bf16 %v1092_v9, %v1089_v21 }
 0x647   :  { %v4089_v12 = vpop.f32.mrf.mxu1 }
 0x648   :  { %3247 = vmatprep.mubr.msk.bf16.mxu0 %vm391_vm0, %v1106_v8 }
 0x649   :  { %3248 = vmatmul.mubr.msk.bf16.gmra.mxu0 %vm391_vm0, %v1107_v11  ;;  %v4091_v13 = vpop.f32.mrf.mxu1 }
 0x64a   :  { %3267 = vmatprep.mubr.msk.bf16.mxu0 %vm391_vm0, %v1287_v33 }
 0x64b   :  { %v4093_v15 = vpop.f32.mrf.mxu1 }
 0x64d   :  { %v4095_v16 = vpop.f32.mrf.mxu1 }
 0x64f   :  { %v4097_v24 = vpop.f32.mrf.mxu1 }
 0x651   :  { %3268 = vmatmul.mubr.msk.bf16.vlgmr.msra.gmra.mxu0 %vm391_vm0, %v1289_v42  ;;  %v4101_v6 = vpop.f32.mrf.mxu1 }
 0x653   :  { %v4105_v27 = vpop.f32.mrf.mxu1 }
 0x655   :  { %v4109_v10 = vpop.f32.mrf.mxu1 }
 0x657   :  { %v3277_v28 = vpop.f32.mrf.mxu1 }
 0x658   :  { %v1430_v19 = vmul.f32 0.17677669, %v3277_v28 }
 0x659   :  { %v1409_v44 = vpop.f32.mrf.mxu1 }
 0x65a   :  { %v1428_v1 = vmul.f32 0.17677669, %v1409_v44  ;;  %v1450_v56 = vsel %vm391_vm0, %v1430_v19, -inf }
 0x65b   :  { %v3278_v31 = vpop.f32.mrf.mxu1 }
 0x65c   :  { %v1431_v54 = vmul.f32 0.17677669, %v3278_v31  ;;  %v1444_v22 = vsel %vm391_vm0, %v1428_v1, -inf }
 0x65d   :  { %v1412_v59 = vpop.f32.mrf.mxu1 }
 0x65e   :  { %v1429_v47 = vmul.f32 0.17677669, %v1412_v59  ;;  %v1453_v23 = vsel %vm391_vm0, %v1431_v54, -inf }
 0x660   :  { %v1447_v62 = vsel %vm391_vm0, %v1429_v47, -inf }
 0x6e3   :  { %v4099_v3 = vpop.f32.mrf.mxu0 }
 0x6e5   :  { %v4103_v25 = vpop.f32.mrf.mxu0 }
 0x6e7   :  { %v4107_v30 = vpop.f32.mrf.mxu0 }
 0x6e9   :  { %v4111_v7 = vpop.f32.mrf.mxu0 }
 0x709   :  { %v4113_v26 = vpop.f32.mrf.mxu0 }
 0x70b   :  { %v4115_v41 = vpop.f32.mrf.mxu0 }
 0x70d   :  { %v4117_v43 = vpop.f32.mrf.mxu0 }
 0x70f   :  { %v4119_v46 = vpop.f32.mrf.mxu0 }
 0x711   :  { %v3269_v49 = vpop.f32.mrf.mxu0 }
 0x712   :  { %v1426_v57 = vmul.f32 0.17677669, %v3269_v49 }
 0x713   :  { %v1340_v32 = vpop.f32.mrf.mxu0 }
 0x714   :  { %v1424_v53 = vmul.f32 0.17677669, %v1340_v32  ;;  %v1438_v42 = vsel %vm391_vm0, %v1426_v57, -inf }
 0x715   :  { %v3270_v55 = vpop.f32.mrf.mxu0 }
 0x716   :  { %v1432_v58 = vsel %vm391_vm0, %v1424_v53, -inf  ;;  %v4124_v52 = vmul.f32 0.17677669, %v3270_v55 }
 0x717   :  { %1433 = vmax.xlane.f32.xlu0 %v1432_v58  ;;  %v1343_v33 = vpop.f32.mrf.mxu0 }
 0x718   :  { %v4122_v29 = vmul.f32 0.17677669, %v1343_v33  ;;  %v1441_v61 = vsel %vm391_vm0, %v4124_v52, -inf }
 0x71a   :  { %v1435_v0 = vsel %vm391_vm0, %v4122_v29, -inf }
 0x71b   :  { %1439 = vmax.xlane.f32.xlu0 %v1438_v42  ;;  %1436 = vmax.xlane.f32.xlu1 %v1435_v0 }
 0x71f   :  { %1442 = vmax.xlane.f32.xlu0 %v1441_v61  ;;  %1448 = vmax.xlane.f32.xlu1 %v1447_v62 }
 0x723   :  { %1445 = vmax.xlane.f32.xlu0 %v1444_v22  ;;  %1454 = vmax.xlane.f32.xlu1 %v1453_v23 }
 0x727   :  { %1451 = vmax.xlane.f32.xlu0 %v1450_v56 }
 0x7a0   :  { %v1434_v60 = vpop.xlane.xlu0 %1433 }
 0x7a1   :  { %v1456_v42 = vsub.f32 %v1424_v53, %v1434_v60 }
 0x7a3   :  { %v1464_v61 = vmul.f32 1.442695, %v1456_v42 }
 0x7a4   :  { %v1437_v18 = vpop.xlane.xlu1 %1436  ;;  %v1440_v20 = vpop.xlane.xlu0 %1439 }
 0x7a5   :  { %v1458_v55 = vsub.f32 %v1426_v57, %v1440_v20 }
 0x7a7   :  { %v1468_v0 = vmul.f32 1.442695, %v1458_v55 }
 0x7a8   :  { %v1449_v21 = vpop.xlane.xlu1 %1448  ;;  %v1443_v5 = vpop.xlane.xlu0 %1442 }
 0x7a9   :  { %v1461_v9 = vsub.f32 %v1429_v47, %v1449_v21  ;;  %v1459_v21 = vsub.f32 %v4124_v52, %v1443_v5 }
 0x7ab   :  { %v1474_v8 = vmul.f32 1.442695, %v1461_v9  ;;  %v1457_v9 = vsub.f32 %v4122_v29, %v1437_v18 }
 0x7ac   :  { %v1455_v11 = vpop.xlane.xlu1 %1454  ;;  %v1446_v44 = vpop.xlane.xlu0 %1445 }
 0x7ad   :  { %3518 = vpow2.f32 %v1474_v8  ;;  %v1463_v28 = vsub.f32 %v1431_v54, %v1455_v11  ;;  %v1460_v49 = vsub.f32 %v1428_v1, %v1446_v44  ;;  %v1470_v8 = vmul.f32 1.442695, %v1459_v21 }
 0x7ae   :  { %v1466_v11 = vmul.f32 1.442695, %v1457_v9 }
 0x7af   :  { %v1478_v31 = vmul.f32 1.442695, %v1463_v28  ;;  %v1472_v32 = vmul.f32 1.442695, %v1460_v49 }
 0x7b0   :  { %v1452_v58 = vpop.xlane.xlu0 %1451 }
 0x7b1   :  { %3520 = vpow2.f32 %v1478_v31  ;;  %v1462_v59 = vsub.f32 %v1430_v19, %v1452_v58 }
 0x7b2   :  { %3522 = vpow2.f32 %v1472_v32 }
 0x7b3   :  { %v1476_v33 = vmul.f32 1.442695, %v1462_v59 }
 0x7b5   :  { %3524 = vpow2.f32 %v1476_v33 }
 0x7b6   :  { %3526 = vpow2.f32 %v1468_v0 }
 0x7b7   :  { %3528 = vpow2.f32 %v1464_v61 }
 0x7b8   :  { %3530 = vpow2.f32 %v1470_v8 }
 0x7b9   :  { %3532 = vpow2.f32 %v1466_v11 }
 0x7ba   :  { %v3519_v47 = vpop.eup %3518 }
 0x7bb   :  { %v1495_v62 = vsel %vm391_vm0, %v3519_v47, 0.0 }
 0x7bc   :  { %1496 = vadd.xlane.f32.xlu1 %v1495_v62 }
 0x7be   :  { %v4136_v54 = vpop.eup %3520 }
 0x7bf   :  { %v3523_v1 = vpop.eup %3522  ;;  %v1501_v57 = vsel %vm391_vm0, %v4136_v54, 0.0 }
 0x7c0   :  { %1502 = vadd.xlane.f32.xlu1 %v1501_v57  ;;  %v1492_v19 = vsel %vm391_vm0, %v3523_v1, 0.0 }
 0x7c1   :  { %1493 = vadd.xlane.f32.xlu0 %v1492_v19 }
 0x7c2   :  { %v4141_v53 = vpop.eup %3524 }
 0x7c3   :  { %v1498_v22 = vsel %vm391_vm0, %v4141_v53, 0.0  ;;  %v4145_v23 = vpop.eup %3526 }
 0x7c4   :  { %v1486_v56 = vsel %vm391_vm0, %v4145_v23, 0.0  ;;  %v4149_v60 = vpop.eup %3528 }
 0x7c5   :  { %1499 = vadd.xlane.f32.xlu0 %v1498_v22  ;;  %v1480_v20 = vsel %vm391_vm0, %v4149_v60, 0.0  ;;  %v4169_v52 = vpop.eup %3530 }
 0x7c6   :  { %v1489_v29 = vsel %vm391_vm0, %v4169_v52, 0.0  ;;  %v4173_v18 = vpop.eup %3532 }
 0x7c9   :  { %1487 = vadd.xlane.f32.xlu0 %v1486_v56 }
 0x7cd   :  { %1481 = vadd.xlane.f32.xlu0 %v1480_v20 }
 0x7d1   :  { %1524 = vrot.lane.b32.xlu1 %v3858_v36, %s3646_s25 }
 0x7d5   :  { %1587 = vrot.lane.b32.xlu1 %v3874_v45, %s3646_s25 }
 0x7e3   :  { %1526 = vrot.lane.b32.xlu0 %v3847_v17, %s3646_s25 }
 0x7e7   :  { %1753 = vrot.lane.b32.xlu0 %v3831_v63, %s3647_s15  ;;  %v1483_v63 = vsel %vm391_vm0, %v4173_v18, 0.0 }
 0x7eb   :  { %1747 = vrot.lane.b32.xlu0 %v3823_v48, %s3647_s15 }
 0x7ef   :  { %1822 = vrot.lane.b32.xlu0 %v3862_v40, %s3647_s15 }
 0x7f3   :  { %1816 = vrot.lane.b32.xlu0 %v3843_v14, %s3647_s15 }
 0x7f9   :  { %1490 = vadd.xlane.f32.xlu1 %v1489_v29 }
 0x7fd   :  { %1484 = vadd.xlane.f32.xlu1 %v1483_v63 }
 0x80e   :  { %1585 = vrot.lane.b32.xlu1 %v3854_v34, %s3646_s25 }
 0x812   :  { %1751 = vrot.lane.b32.xlu1 %v3833_v4, %s3647_s15 }
 0x816   :  { %1749 = vrot.lane.b32.xlu1 %v3856_v35, %s3647_s15 }
 0x81a   :  { %1820 = vrot.lane.b32.xlu1 %v3860_v37, %s3647_s15 }
 0x81e   :  { %1818 = vrot.lane.b32.xlu1 %v3882_v51, %s3647_s15  ;;  %v3410_v51 = vld [vmem:[%s4592_s3 + $0x28] sm:$0xff]  }
 0x845   :  { %v1497_v48 = vpop.xlane.xlu1 %1496 }
 0x846   :  { %3534 = vrcp.f32 %v1497_v48 }
 0x849   :  { %v1503_v14 = vpop.xlane.xlu1 %1502 }
 0x84a   :  { %v1494_v40 = vpop.xlane.xlu0 %1493 }
 0x84b   :  { %3536 = vrcp.f32 %v1494_v40  ;;  %v3411_v40 = vld [vmem:[%s4592_s3 + $0x20] sm:$0xff]  }
 0x84d   :  { %v1525_v5 = vpop.permute.xlu1 %1524 }
 0x84e   :  { %v1500_v44 = vpop.xlane.xlu0 %1499 }
 0x84f   :  { %3538 = vrcp.f32 %v1500_v44 }
 0x850   :  { %3540 = vrcp.f32 %v1503_v14 }
 0x851   :  { %v1588_v28 = vpop.permute.xlu1 %1587 }
 0x852   :  { %v1488_v49 = vpop.xlane.xlu0 %1487  ;;  %3287 = vmatprep.subr.bf16.mxu1 %v1588_v28 }
 0x853   :  { %3288 = vmatpush3.bf16.msra.mxu1 %v1588_v28  ;;  %v3535_v4 = vpop.eup %3534 }
 0x854   :  { %v1515_v55 = vmul.f32 %v3535_v4, %v3519_v47 }
 0x856   :  { %v1482_v31 = vpop.xlane.xlu0 %1481 }
 0x858   :  { %v3537_v35 = vpop.eup %3536 }
 0x859   :  { %v1513_v32 = vmul.f32 %v3537_v35, %v3523_v1 }
 0x85a   :  { %v1527_v37 = vpop.permute.xlu0 %1526 }
 0x85b   :  { %3279 = vmatprep.subr.bf16.mxu0 %v1527_v37  ;;  %v1522_v58 = vpack.c.bf16 %v1515_v55, %v1513_v32 }
 0x85c   :  { %3280 = vmatpush3.bf16.msra.mxu0 %v1527_v37  ;;  %v3539_v33 = vpop.eup %3538 }
 0x85d   :  { %3281 = vmatprep.subr.bf16.mxu0 %v1525_v5  ;;  %3291 = vmatprep.mubr.msk.bf16.mxu1 %vm391_vm0, %v1522_v58  ;;  %v3541_v0 = vpop.eup %3540  ;;  %v1517_v47 = vmul.f32 %v3539_v33, %v4141_v53 }
 0x85e   :  { %v1754_v61 = vpop.permute.xlu0 %1753  ;;  %v1519_v1 = vmul.f32 %v3541_v0, %v4136_v54 }
 0x85f   :  { %v1765_v19 = vsel %vm391_vm0, %v1754_v61, 0 }
 0x860   :  { %3282 = vmatpush3.bf16.msra.mxu0 %v1525_v5  ;;  %v1523_v57 = vpack.c.bf16 %v1519_v1, %v1517_v47 }
 0x861   :  { %3295 = vmatprep.subr.bf16.mxu0 %v3410_v51 }
 0x862   :  { %v1748_v22 = vpop.permute.xlu0 %1747 }
 0x882   :  { %v1491_v59 = vpop.xlane.xlu1 %1490 }
 0x883   :  { %3542 = vrcp.f32 %v1491_v59 }
 0x884   :  { %3544 = vrcp.f32 %v1482_v31 }
 0x885   :  { %3546 = vrcp.f32 %v1488_v49 }
 0x886   :  { %v1485_v42 = vpop.xlane.xlu1 %1484 }
 0x887   :  { %3548 = vrcp.f32 %v1485_v42 }
 0x88a   :  { %v1586_v62 = vpop.permute.xlu1 %1585 }
 0x88b   :  { %3289 = vmatprep.subr.bf16.mxu1 %v1586_v62 }
 0x88c   :  { %3290 = vmatpush3.bf16.msra.mxu1 %v1586_v62 }
 0x88d   :  { %3363 = vmatprep.subr.msk.bf16.mxu1 %vm391_vm0, %v1754_v61 }
 0x88e   :  { %v1752_v56 = vpop.permute.xlu1 %1751 }
 0x88f   :  { %3292 = vmatmul.mubr.msk.bf16.vlgmr.msra.gmra.mxu1 %vm391_vm0, %v1523_v57  ;;  %v1762_v63 = vsel %vm391_vm0, %v1752_v56, 0 }
 0x890   :  { %3308 = vmatpush3.bf16.xpose.msra.mxu1 %v1765_v19  ;;  %3311 = vmatprep.mubr.msk.bf16.mxu1 %vm391_vm0, %v1748_v22  ;;  %v3543_v20 = vpop.eup %3542 }
 0x891   :  { %3364 = vmatprep.subr.msk.bf16.mxu1 %vm391_vm0, %v1752_v56  ;;  %v3545_v53 = vpop.eup %3544  ;;  %v1511_v54 = vmul.f32 %v3543_v20, %v4169_v52  ;;  %v1823_v52 = vpop.permute.xlu0 %1822 }
 0x892   :  { %v3547_v21 = vpop.eup %3546  ;;  %v1505_v8 = vmul.f32 %v3545_v53, %v4149_v60  ;;  %v1750_v60 = vpop.permute.xlu1 %1749  ;;  %v1834_v33 = vsel %vm391_vm0, %v1823_v52, 0 }
 0x893   :  { %v1509_v29 = vmul.f32 %v3547_v21, %v4145_v23 }
 0x894   :  { %v3549_v9 = vpop.eup %3548 }
 0x895   :  { %v1507_v11 = vmul.f32 %v3549_v9, %v4173_v18  ;;  %v1521_v14 = vpack.c.bf16 %v1511_v54, %v1509_v29  ;;  %v1817_v56 = vpop.permute.xlu0 %1816  ;;  %v1264_v54 = vadd.f32 %v4089_v12, %v4099_v3 }
 0x896   :  { %v1821_v0 = vpop.permute.xlu1 %1820 }
 0x897   :  { %v1520_v48 = vpack.c.bf16 %v1507_v11, %v1505_v8  ;;  %v1831_v20 = vsel %vm391_vm0, %v1821_v0, 0  ;;  %v1256_v11 = vadd.f32 %v4091_v13, %v4103_v25  ;;  %v1280_v13 = vadd.f32 %v4097_v24, %v4113_v26 }
 0x898   :  { %3310 = vmatpush3.bf16.xpose.msra.mxu1 %v1762_v63  ;;  %v1275_v24 = vadd.f32 %v4109_v10, %v4119_v46 }
 0x899   :  { %3283 = vmatprep.mubr.msk.bf16.mxu0 %vm391_vm0, %v1520_v48  ;;  %v1267_v48 = vadd.f32 %v4093_v15, %v4107_v30  ;;  %v1272_v15 = vadd.f32 %v4101_v6, %v4115_v41 }
 0x89a   :  { %3284 = vmatmul.mubr.msk.bf16.vlgmr.msra.gmra.mxu0 %vm391_vm0, %v1521_v14  ;;  %v1819_v21 = vpop.permute.xlu1 %1818 }
 0x89b   :  { %3296 = vmatpush3.bf16.msra.mxu0 %v3410_v51 }
 0x89c   :  { %3297 = vmatprep.subr.bf16.mxu0 %v3411_v40 }
 0x89f   :  { %3298 = vmatpush3.bf16.msra.mxu0 %v3411_v40  ;;  %3312 = vmatmul.mubr.msk.bf16.vlgmr.msra.gmra.mxu1 %vm391_vm0, %v1750_v60 }
 0x8a0   :  { %3365 = vmatprep.subr.msk.bf16.mxu0 %vm391_vm0, %v1823_v52  ;;  %v1259_v52 = vadd.f32 %v4095_v16, %v4111_v7 }
 0x94f   :  { %v3293_v23 = vpop.f32.mrf.mxu1 }
 0x951   :  { %v1631_v18 = vpop.f32.mrf.mxu1 }
 0x953   :  { %v3294_v5 = vpop.f32.mrf.mxu1 }
 0x954   :  { %v1649_v22 = vpack.c.bf16 %v3294_v5, %v3293_v23 }
 0x955   :  { %v1634_v49 = vpop.f32.mrf.mxu1 }
 0x956   :  { %v1648_v51 = vpack.c.bf16 %v1634_v49, %v1631_v18 }
 0x95a   :  { %v3285_v44 = vpop.f32.mrf.mxu0 }
 0x95c   :  { %v1570_v28 = vpop.f32.mrf.mxu0 }
 0x95e   :  { %v3286_v4 = vpop.f32.mrf.mxu0 }
 0x95f   :  { %v3313_v31 = vpop.f32.mrf.mxu1  ;;  %v1647_v37 = vpack.c.bf16 %v3286_v4, %v3285_v44  ;;  %v1283_v4 = vadd.f32 %v4105_v27, %v4117_v43 }
 0x960   :  { %v1573_v35 = vpop.f32.mrf.mxu0  ;;  %v1887_v61 = vmul.f32 0.17677669, %v3313_v31 }
 0x961   :  { %v1646_v32 = vpack.c.bf16 %v1573_v35, %v1570_v28  ;;  %v1801_v55 = vpop.f32.mrf.mxu1 }
 0x962   :  { %v1885_v58 = vmul.f32 0.17677669, %v1801_v55  ;;  %v1899_v19 = vsel %vm391_vm0, %v1887_v61, -inf }
 0x963   :  { %3299 = vmatprep.mubr.msk.bf16.mxu0 %vm391_vm0, %v1646_v32  ;;  %v3314_v59 = vpop.f32.mrf.mxu1 }
 0x964   :  { %3300 = vmatmul.mubr.msk.bf16.vlgmr.msra.gmra.mxu0 %vm391_vm0, %v1647_v37  ;;  %v1893_v42 = vsel %vm391_vm0, %v1885_v58, -inf  ;;  %v1888_v57 = vmul.f32 0.17677669, %v3314_v59 }
 0x965   :  { %3316 = vmatpush3.bf16.xpose.msra.mxu0 %v1834_v33  ;;  %3303 = vmatprep.mubr.msk.bf16.mxu0 %vm391_vm0, %v1648_v51  ;;  %v1804_v47 = vpop.f32.mrf.mxu1 }
 0x966   :  { %1894 = vmax.xlane.f32.xlu0 %v1893_v42  ;;  %v1886_v62 = vmul.f32 0.17677669, %v1804_v47  ;;  %3366 = vmatprep.subr.msk.bf16.mxu0 %vm391_vm0, %v1821_v0  ;;  %v1902_v53 = vsel %vm391_vm0, %v1888_v57, -inf }
 0x968   :  { %v1896_v1 = vsel %vm391_vm0, %v1886_v62, -inf }
 0x969   :  { %1897 = vmax.xlane.f32.xlu1 %v1896_v1 }
 0x96a   :  { %1900 = vmax.xlane.f32.xlu0 %v1899_v19 }
 0x96c   :  { %3304 = vmatmul.mubr.msk.bf16.gmra.mxu0 %vm391_vm0, %v1649_v22 }
 0x96d   :  { %3318 = vmatpush3.bf16.xpose.msra.mxu0 %v1831_v20  ;;  %3319 = vmatprep.mubr.msk.bf16.mxu0 %vm391_vm0, %v1817_v56 }
 0x96e   :  { %1903 = vmax.xlane.f32.xlu0 %v1902_v53 }
 0x974   :  { %3320 = vmatmul.mubr.msk.bf16.vlgmr.msra.gmra.mxu0 %vm391_vm0, %v1819_v21 }
 0x9ef   :  { %v1895_v9 = vpop.xlane.xlu0 %1894 }
 0x9f0   :  { %v1917_v23 = vsub.f32 %v1885_v58, %v1895_v9 }
 0x9f2   :  { %v1898_v18 = vpop.xlane.xlu1 %1897  ;;  %v1925_v30 = vmul.f32 1.442695, %v1917_v23 }
 0x9f3   :  { %v1901_v40 = vpop.xlane.xlu0 %1900  ;;  %v1918_v5 = vsub.f32 %v1886_v62, %v1898_v18 }
 0x9f4   :  { %v1919_v28 = vsub.f32 %v1887_v61, %v1901_v40  ;;  %3550 = vpow2.f32 %v1925_v30 }
 0x9f5   :  { %v1927_v26 = vmul.f32 1.442695, %v1918_v5 }
 0x9f6   :  { %v1929_v32 = vmul.f32 1.442695, %v1919_v28 }
 0x9f7   :  { %v1904_v16 = vpop.xlane.xlu0 %1903  ;;  %3552 = vpow2.f32 %v1927_v26 }
 0x9f8   :  { %v1920_v55 = vsub.f32 %v1888_v57, %v1904_v16  ;;  %3554 = vpow2.f32 %v1929_v32 }
 0x9fa   :  { %v1931_v51 = vmul.f32 1.442695, %v1920_v55 }
 0x9fc   :  { %3556 = vpow2.f32 %v1931_v51 }
 0xa01   :  { %v3551_v62 = vpop.eup %3550 }
 0xa02   :  { %v1941_v19 = vsel %vm391_vm0, %v3551_v62, 0.0 }
 0xa04   :  { %v3553_v1 = vpop.eup %3552 }
 0xa05   :  { %v4260_v22 = vpop.eup %3554  ;;  %v1944_v56 = vsel %vm391_vm0, %v3553_v1, 0.0 }
 0xa06   :  { %v1947_v20 = vsel %vm391_vm0, %v4260_v22, 0.0 }
 0xa09   :  { %v4265_v53 = vpop.eup %3556 }
 0xa0a   :  { %v1950_v21 = vsel %vm391_vm0, %v4265_v53, 0.0 }
 0xa24   :  { %v3301_v8 = vpop.f32.mrf.mxu0 }
 0xa25   :  { %v4227_v29 = vadd.f32 %v3301_v8, %v1264_v54 }
 0xa26   :  { %v1708_v63 = vpop.f32.mrf.mxu0 }
 0xa27   :  { %v4231_v14 = vadd.f32 %v1708_v63, %v1256_v11 }
 0xa28   :  { %v3302_v60 = vpop.f32.mrf.mxu0 }
 0xa29   :  { %v4235_v12 = vadd.f32 %v3302_v60, %v1267_v48 }
 0xa2a   :  { %v1711_v3 = vpop.f32.mrf.mxu0 }
 0xa2b   :  { %v4239_v25 = vadd.f32 %v1711_v3, %v1259_v52 }
 0xa2c   :  { %v3305_v44 = vpop.f32.mrf.mxu0 }
 0xa2d   :  { %v4243_v49 = vadd.f32 %v3305_v44, %v1280_v13 }
 0xa2e   :  { %v1724_v7 = vpop.f32.mrf.mxu0 }
 0xa2f   :  { %v4247_v31 = vadd.f32 %v1724_v7, %v1272_v15 }
 0xa30   :  { %v3306_v35 = vpop.f32.mrf.mxu0 }
 0xa31   :  { %v4251_v6 = vadd.f32 %v3306_v35, %v1283_v4 }
 0xa32   :  { %v1727_v41 = vpop.f32.mrf.mxu0 }
 0xa33   :  { %v4253_v37 = vadd.f32 %v1727_v41, %v1275_v24 }
 0xa34   :  { %v3321_v58 = vpop.f32.mrf.mxu0 }
 0xa35   :  { %v1891_v33 = vmul.f32 0.17677669, %v3321_v58 }
 0xa36   :  { %v1870_v27 = vpop.f32.mrf.mxu0 }
 0xa37   :  { %v1889_v43 = vmul.f32 0.17677669, %v1870_v27  ;;  %v1911_v61 = vsel %vm391_vm0, %v1891_v33, -inf }
 0xa38   :  { %v3322_v59 = vpop.f32.mrf.mxu0 }
 0xa39   :  { %v1905_v10 = vsel %vm391_vm0, %v1889_v43, -inf  ;;  %v1892_v0 = vmul.f32 0.17677669, %v3322_v59 }
 0xa3a   :  { %1906 = vmax.xlane.f32.xlu0 %v1905_v10  ;;  %v1873_v46 = vpop.f32.mrf.mxu0 }
 0xa3b   :  { %v1890_v42 = vmul.f32 0.17677669, %v1873_v46  ;;  %v1914_v57 = vsel %vm391_vm0, %v1892_v0, -inf }
 0xa3d   :  { %v1908_v47 = vsel %vm391_vm0, %v1890_v42, -inf }
 0xa3e   :  { %1912 = vmax.xlane.f32.xlu0 %v1911_v61  ;;  %1909 = vmax.xlane.f32.xlu1 %v1908_v47 }
 0xa42   :  { %1915 = vmax.xlane.f32.xlu1 %v1914_v57  ;;  %1942 = vadd.xlane.f32.xlu0 %v1941_v19 }
 0xa46   :  { %1945 = vadd.xlane.f32.xlu1 %v1944_v56  ;;  %1948 = vadd.xlane.f32.xlu0 %v1947_v20 }
 0xa4a   :  { %1951 = vadd.xlane.f32.xlu1 %v1950_v21 }
 0xa5b   :  { %1985 = vrot.lane.b32.xlu1 %v3858_v36, %s3647_s15 }
 0xa5f   :  { %2048 = vrot.lane.b32.xlu1 %v3874_v45, %s3647_s15 }
 0xac3   :  { %v1907_v9 = vpop.xlane.xlu0 %1906 }
 0xac4   :  { %v1921_v54 = vsub.f32 %v1889_v43, %v1907_v9 }
 0xac6   :  { %v1933_v48 = vmul.f32 1.442695, %v1921_v54 }
 0xac7   :  { %v1910_v8 = vpop.xlane.xlu1 %1909  ;;  %v1913_v11 = vpop.xlane.xlu0 %1912 }
 0xac8   :  { %v1923_v63 = vsub.f32 %v1891_v33, %v1913_v11  ;;  %v1922_v40 = vsub.f32 %v1890_v42, %v1910_v8 }
 0xaca   :  { %v1937_v60 = vmul.f32 1.442695, %v1923_v63  ;;  %v1935_v3 = vmul.f32 1.442695, %v1922_v40 }
 0xacb   :  { %v1916_v52 = vpop.xlane.xlu1 %1915  ;;  %v1943_v18 = vpop.xlane.xlu0 %1942 }
 0xacc   :  { %v1924_v23 = vsub.f32 %v1892_v0, %v1916_v52  ;;  %3558 = vpow2.f32 %v1937_v60 }
 0xacd   :  { %3560 = vpow2.f32 %v1933_v48 }
 0xace   :  { %v1939_v13 = vmul.f32 1.442695, %v1924_v23  ;;  %3562 = vrcp.f32 %v1943_v18 }
 0xacf   :  { %v1946_v36 = vpop.xlane.xlu1 %1945  ;;  %v1949_v51 = vpop.xlane.xlu0 %1948 }
 0xad0   :  { %3564 = vpow2.f32 %v1939_v13 }
 0xad1   :  { %3566 = vrcp.f32 %v1946_v36 }
 0xad2   :  { %3568 = vpow2.f32 %v1935_v3 }
 0xad3   :  { %v1952_v45 = vpop.xlane.xlu1 %1951 }
 0xad4   :  { %3570 = vrcp.f32 %v1952_v45 }
 0xad5   :  { %3572 = vrcp.f32 %v1949_v51 }
 0xad7   :  { %v1986_v5 = vpop.permute.xlu1 %1985 }
 0xad9   :  { %v3559_v44 = vpop.eup %3558 }
 0xada   :  { %v3561_v15 = vpop.eup %3560  ;;  %v1959_v28 = vsel %vm391_vm0, %v3559_v44, 0.0 }
 0xadb   :  { %v2049_v30 = vpop.permute.xlu1 %2048  ;;  %v3563_v16 = vpop.eup %3562  ;;  %1960 = vadd.xlane.f32.xlu0 %v1959_v28  ;;  %v1953_v35 = vsel %vm391_vm0, %v3561_v15, 0.0 }
 0xadc   :  { %3331 = vmatprep.subr.bf16.mxu0 %v2049_v30  ;;  %v1966_v32 = vmul.f32 %v3563_v16, %v3551_v62 }
 0xadd   :  { %v3565_v7 = vpop.eup %3564  ;;  %3332 = vmatpush3.bf16.msra.mxu0 %v2049_v30  ;;  %v2975_v30 = vld [vmem:[%s4593_s4] ss:$0 sm:$0xff] }
 0xade   :  { %v3567_v4 = vpop.eup %3566  ;;  %v1962_v24 = vsel %vm391_vm0, %v3565_v7, 0.0 }
 0xadf   :  { %v3569_v26 = vpop.eup %3568  ;;  %1963 = vadd.xlane.f32.xlu1 %v1962_v24  ;;  %v1968_v55 = vmul.f32 %v3567_v4, %v3553_v1  ;;  %1954 = vadd.xlane.f32.xlu0 %v1953_v35  ;;  %v3614_v35 = vld [vmem:[%s4589_s0] sm:$0xff] }
 0xae0   :  { %v1956_v58 = vsel %vm391_vm0, %v3569_v26, 0.0 }
 0xae1   :  { %v1981_v41 = vpack.c.bf16 %v1968_v55, %v1966_v32  ;;  %v3571_v10 = vpop.eup %3570 }
 0xae2   :  { %v3573_v42 = vpop.eup %3572 }
 0xae3   :  { %3327 = vmatprep.mubr.msk.bf16.mxu1 %vm391_vm0, %v1981_v41  ;;  %1957 = vadd.xlane.f32.xlu1 %v1956_v58  ;;  %v1970_v0 = vmul.f32 %v3573_v42, %v4260_v22  ;;  %v3412_v22 = vld [vmem:[%s4592_s3 + $0x38] sm:$0xff]   ;;  %v3615_v41 = vld [vmem:[%s4589_s0 + $0x10] sm:$0xff] }
 0xaf4   :  { %2046 = vrot.lane.b32.xlu1 %v3854_v34, %s3647_s15 }
 0xaf5   :  { %1987 = vrot.lane.b32.xlu0 %v3847_v17, %s3647_s15  ;;  %v1972_v17 = vmul.f32 %v3571_v10, %v4265_v53  ;;  %v3413_v53 = vld [vmem:[%s4592_s3 + $0x30] sm:$0xff]   ;;  %v3617_v10 = vld [vmem:[%s4589_s0 + $0x18] sm:$0xff] }
 0xaf7   :  { %v1982_v61 = vpack.c.bf16 %v1972_v17, %v1970_v0  ;;  %v3618_v0 = vld [vmem:[%s4589_s0 + $0x20] sm:$0xff] }
 0xb64   :  { %v1961_v27 = vpop.xlane.xlu0 %1960 }
 0xb68   :  { %v1964_v43 = vpop.xlane.xlu1 %1963  ;;  %v1955_v59 = vpop.xlane.xlu0 %1954 }
 0xb69   :  { %3574 = vrcp.f32 %v1964_v43 }
 0xb6a   :  { %3576 = vrcp.f32 %v1955_v59 }
 0xb6b   :  { %3578 = vrcp.f32 %v1961_v27 }
 0xb6c   :  { %v1958_v33 = vpop.xlane.xlu1 %1957  ;;  %v1988_v46 = vpop.permute.xlu0 %1987 }
 0xb6d   :  { %3580 = vrcp.f32 %v1958_v33  ;;  %3323 = vmatprep.subr.bf16.mxu1 %v1988_v46 }
 0xb6e   :  { %3324 = vmatpush3.bf16.msra.mxu1 %v1988_v46 }
 0xb6f   :  { %3325 = vmatprep.subr.bf16.mxu1 %v1986_v5 }
 0xb70   :  { %v2047_v34 = vpop.permute.xlu1 %2046 }
 0xb71   :  { %3333 = vmatprep.subr.bf16.mxu0 %v2047_v34 }
 0xb72   :  { %3334 = vmatpush3.bf16.msra.mxu0 %v2047_v34  ;;  %3326 = vmatpush3.bf16.msra.mxu1 %v1986_v5 }
 0xb73   :  { %3339 = vmatprep.subr.bf16.mxu1 %v3412_v22 }
 0xb75   :  { %3328 = vmatmul.mubr.msk.bf16.vlgmr.msra.gmra.mxu1 %vm391_vm0, %v1982_v61 }
 0xb76   :  { %v3575_v47 = vpop.eup %3574  ;;  %3340 = vmatpush3.bf16.msra.mxu1 %v3412_v22 }
 0xb77   :  { %v3577_v62 = vpop.eup %3576  ;;  %v1980_v19 = vmul.f32 %v3575_v47, %v3565_v7  ;;  %3341 = vmatprep.subr.bf16.mxu1 %v3413_v53 }
 0xb78   :  { %v3579_v1 = vpop.eup %3578  ;;  %v1974_v56 = vmul.f32 %v3577_v62, %v3561_v15  ;;  %v3619_v62 = vld [vmem:[%s4589_s0 + $0x28] sm:$0xff] }
 0xb79   :  { %v1978_v21 = vmul.f32 %v3579_v1, %v3559_v44 }
 0xb7a   :  { %v3581_v57 = vpop.eup %3580  ;;  %3342 = vmatpush3.bf16.msra.mxu1 %v3413_v53 }
 0xb7b   :  { %v1976_v20 = vmul.f32 %v3581_v57, %v3569_v26  ;;  %v1984_v54 = vpack.c.bf16 %v1980_v19, %v1978_v21  ;;  %v3621_v57 = vld [vmem:[%s4589_s0 + $0x38] sm:$0xff] }
 0xb7d   :  { %v1983_v9 = vpack.c.bf16 %v1976_v20, %v1974_v56  ;;  %v3414_v56 = vld [vmem:[%s4596_s7 + $0x70] ss:$8 sps:$4 sm:$0xff]   ;;  %v3416_v20 = vld [vmem:[%s4596_s7 + $0x74] ss:$8 sps:$4 sm:$0xff]  }
 0xb7e   :  { %2462 = vmatprep.subr.bf16.mxu0 %v3416_v20 }
 0xb7f   :  { %3335 = vmatprep.mubr.msk.bf16.mxu0 %vm391_vm0, %v1983_v9 }
 0xb80   :  { %3336 = vmatmul.mubr.msk.bf16.vlgmr.msra.gmra.mxu0 %vm391_vm0, %v1984_v54 }
 0xb81   :  { %2494 = vmatprep.mubr.bf16.mxu0 %v3644_v2  ;;  %2463 = vmatpush1.bf16.msra.mxu0 %v3414_v56 }
 0xc35   :  { %v3329_v8 = vpop.f32.mrf.mxu1 }
 0xc37   :  { %v2031_v11 = vpop.f32.mrf.mxu1 }
 0xc39   :  { %v3330_v63 = vpop.f32.mrf.mxu1 }
 0xc3a   :  { %v2108_v60 = vpack.c.bf16 %v3330_v63, %v3329_v8 }
 0xc3b   :  { %v2034_v48 = vpop.f32.mrf.mxu1 }
 0xc3c   :  { %v2107_v40 = vpack.c.bf16 %v2034_v48, %v2031_v11 }
 0xc3e   :  { %3343 = vmatprep.mubr.msk.bf16.mxu1 %vm391_vm0, %v2107_v40 }
 0xc3f   :  { %3344 = vmatmul.mubr.msk.bf16.vlgmr.msra.gmra.mxu1 %vm391_vm0, %v2108_v60 }
 0xc40   :  { %v3337_v52 = vpop.f32.mrf.mxu0 }
 0xc42   :  { %v2092_v23 = vpop.f32.mrf.mxu0 }
 0xc44   :  { %v3338_v18 = vpop.f32.mrf.mxu0 }
 0xc45   :  { %v2110_v36 = vpack.c.bf16 %v3338_v18, %v3337_v52 }
 0xc46   :  { %v2095_v3 = vpop.f32.mrf.mxu0 }
 0xc47   :  { %v2109_v13 = vpack.c.bf16 %v2095_v3, %v2092_v23 }
 0xc49   :  { %3347 = vmatprep.mubr.msk.bf16.mxu1 %vm391_vm0, %v2109_v13 }
 0xc4a   :  { %3348 = vmatmul.mubr.msk.bf16.gmra.mxu1 %vm391_vm0, %v2110_v36 }
 0xcff   :  { %v3345_v45 = vpop.f32.mrf.mxu1 }
 0xd00   :  { %v2202_v44 = vadd.f32 %v3345_v45, %v4227_v29 }
 0xd01   :  { %v2169_v5 = vpop.f32.mrf.mxu1 }
 0xd02   :  { %v2200_v15 = vadd.f32 %v2169_v5, %v4231_v14  ;;  %v2217_v4 = vadd.f32 %v2975_v30, %v2202_v44 }
 0xd03   :  { %v3346_v28 = vpop.f32.mrf.mxu1 }
 0xd04   :  { %v2215_v16 = vadd.f32 %v2975_v30, %v2200_v15  ;;  %v2203_v24 = vadd.f32 %v3346_v28, %v4235_v12  ;;  %v2225_v58 = vadd.f32 %v3615_v41, %v2217_v4  ;;  %v3616_v12 = vld [vmem:[%s4589_s0 + $0x8] sm:$0xff] }
 0xd05   :  { %v2172_v7 = vpop.f32.mrf.mxu1 }
 0xd06   :  { %v2201_v26 = vadd.f32 %v2172_v7, %v4239_v25  ;;  %v2223_v32 = vadd.f32 %v3614_v35, %v2215_v16  ;;  %v2218_v55 = vadd.f32 %v2975_v30, %v2203_v24 }
 0xd08   :  { %v2216_v29 = vadd.f32 %v2975_v30, %v2201_v26  ;;  %2231 = vadd.xlane.f32.xlu0 %v2223_v32  ;;  %v2226_v46 = vadd.f32 %v3617_v10, %v2218_v55  ;;  %v3432_v10 = vld [vmem:[%s4596_s7 + $0x10] ss:$8 sps:$4 sm:$0xff]  }
 0xd0a   :  { %v3349_v14 = vpop.f32.mrf.mxu1  ;;  %v2224_v51 = vadd.f32 %v3616_v12, %v2216_v29  ;;  %v3417_v29 = vld [vmem:[%s4596_s7 + $0x60] ss:$8 sps:$4 sm:$0xff]   ;;  %v3420_v12 = vld [vmem:[%s4596_s7 + $0x50] ss:$8 sps:$4 sm:$0xff]  }
 0xd0b   :  { %v2206_v59 = vadd.f32 %v3349_v14, %v4243_v49 }
 0xd0c   :  { %v2185_v25 = vpop.f32.mrf.mxu1  ;;  %2235 = vadd.xlane.f32.xlu0 %v2225_v58  ;;  %2233 = vadd.xlane.f32.xlu1 %v2224_v51 }
 0xd0d   :  { %v2204_v27 = vadd.f32 %v2185_v25, %v4247_v31  ;;  %v2221_v61 = vadd.f32 %v2975_v30, %v2206_v59  ;;  %v3423_v25 = vld [vmem:[%s4596_s7 + $0x40] ss:$8 sps:$4 sm:$0xff]   ;;  %v3431_v59 = vld [vmem:[%s4596_s7 + $0x24] ss:$8 sps:$4 sm:$0xff]  }
 0xd0e   :  { %v3350_v43 = vpop.f32.mrf.mxu1 }
 0xd0f   :  { %v2219_v33 = vadd.f32 %v2975_v30, %v2204_v27  ;;  %v2207_v34 = vadd.f32 %v3350_v43, %v4251_v6  ;;  %v3620_v6 = vld [vmem:[%s4589_s0 + $0x30] sm:$0xff] }
 0xd10   :  { %v2188_v42 = vpop.f32.mrf.mxu1  ;;  %2237 = vadd.xlane.f32.xlu0 %v2226_v46  ;;  %v3428_v27 = vld [vmem:[%s4596_s7 + $0x34] ss:$8 sps:$4 sm:$0xff]   ;;  %v3426_v43 = vld [vmem:[%s4596_s7 + $0x30] ss:$8 sps:$4 sm:$0xff]  }
 0xd11   :  { %v2205_v17 = vadd.f32 %v2188_v42, %v4253_v37  ;;  %v2227_v31 = vadd.f32 %v3618_v0, %v2219_v33  ;;  %v2222_v49 = vadd.f32 %v2975_v30, %v2207_v34  ;;  %v2229_v37 = vadd.f32 %v3620_v6, %v2221_v61  ;;  %v3429_v33 = vld [vmem:[%s4596_s7 + $0x20] ss:$8 sps:$4 sm:$0xff]   ;;  %v3437_v42 = vld [vmem:[%s4596_s7 + $0x4] ss:$8 sps:$4 sm:$0xff]   ;;  %v3439_v0 = vld [vmem:[%s4598_s9 + $0x38] sm:$0xff]  }
 0xd12   :  { %v3435_v34 = vld [vmem:[%s4596_s7] ss:$8 sps:$4 sm:$0xff]   ;;  %v3441_v61 = vld [vmem:[%s4598_s9 + $0x30] sm:$0xff]   ;;  %v3446_v6 = vld [vmem:[%s4598_s9 + $0x58] sm:$0xff]  }
 0xd13   :  { %v2220_v47 = vadd.f32 %v2975_v30, %v2205_v17  ;;  %v2230_v19 = vadd.f32 %v3621_v57, %v2222_v49  ;;  %v3438_v17 = vld [vmem:[%s4598_s9 + $0x78] sm:$0xff]   ;;  %v3443_v49 = vld [vmem:[%s4598_s9 + $0x28] sm:$0xff]  }
 0xd14   :  { %2239 = vadd.xlane.f32.xlu0 %v2227_v31  ;;  %3111 = vmatprep.subr.bf16.mxu1 %v3438_v17 }
 0xd15   :  { %v2228_v1 = vadd.f32 %v3619_v62, %v2220_v47  ;;  %3112 = vmatpush3.bf16.msra.mxu1 %v3439_v0  ;;  %v3442_v47 = vld [vmem:[%s4598_s9 + $0x68] sm:$0xff]   ;;  %v3444_v62 = vld [vmem:[%s4598_s9 + $0x60] sm:$0xff]  }
 0xd17   :  { %2241 = vadd.xlane.f32.xlu1 %v2228_v1 }
 0xd18   :  { %2243 = vadd.xlane.f32.xlu0 %v2229_v37 }
 0xd1b   :  { %2245 = vadd.xlane.f32.xlu1 %v2230_v19 }
 0xd91   :  { %v2232_v21 = vpop.xlane.xlu0 %2231 }
 0xd92   :  { %v2248_v9 = vmul.f32 0.0078125, %v2232_v21 }
 0xd94   :  { %v4339_v54 = vsub.f32 %v2223_v32, %v2248_v9  ;;  %v3419_v32 = vld [vmem:[%s4596_s7 + $0x64] ss:$8 sps:$4 sm:$0xff]  }
 0xd95   :  { %v2236_v22 = vpop.xlane.xlu0 %2235  ;;  %v2234_v53 = vpop.xlane.xlu1 %2233  ;;  %2464 = vmatprep.subr.bf16.mxu0 %v3419_v32 }
 0xd96   :  { %v2250_v8 = vmul.f32 0.0078125, %v2236_v22  ;;  %v2249_v11 = vmul.f32 0.0078125, %v2234_v53  ;;  %v2264_v63 = vmul.f32 %v4339_v54, %v4339_v54  ;;  %2465 = vmatpush1.bf16.msra.mxu0 %v3417_v29 }
 0xd98   :  { %v4343_v48 = vsub.f32 %v2225_v58, %v2250_v8  ;;  %v4345_v40 = vsub.f32 %v2224_v51, %v2249_v11  ;;  %2272 = vadd.xlane.f32.xlu0 %v2264_v63  ;;  %v3422_v58 = vld [vmem:[%s4596_s7 + $0x54] ss:$8 sps:$4 sm:$0xff]   ;;  %v3425_v51 = vld [vmem:[%s4596_s7 + $0x44] ss:$8 sps:$4 sm:$0xff]  }
 0xd99   :  { %v2238_v60 = vpop.xlane.xlu0 %2237  ;;  %2466 = vmatprep.subr.bf16.mxu0 %v3422_v58 }
 0xd9a   :  { %v2251_v52 = vmul.f32 0.0078125, %v2238_v60  ;;  %v2266_v23 = vmul.f32 %v4343_v48, %v4343_v48  ;;  %v2265_v18 = vmul.f32 %v4345_v40, %v4345_v40  ;;  %2467 = vmatpush1.bf16.msra.mxu0 %v3420_v12  ;;  %v4454_v12 = vld [vmem:[%s4595_s6] ss:$0 sm:$0xff] }
 0xd9b   :  { %2468 = vmatprep.subr.bf16.mxu0 %v3425_v51 }
 0xd9c   :  { %v4351_v3 = vsub.f32 %v2226_v46, %v2251_v52  ;;  %2276 = vadd.xlane.f32.xlu0 %v2266_v23  ;;  %2274 = vadd.xlane.f32.xlu1 %v2265_v18  ;;  %v3434_v46 = vld [vmem:[%s4596_s7 + $0x14] ss:$8 sps:$4 sm:$0xff]  }
 0xd9d   :  { %v2240_v13 = vpop.xlane.xlu0 %2239 }
 0xd9e   :  { %v2252_v36 = vmul.f32 0.0078125, %v2240_v13  ;;  %v2267_v45 = vmul.f32 %v4351_v3, %v4351_v3  ;;  %2469 = vmatpush1.bf16.msra.mxu0 %v3423_v25 }
 0xd9f   :  { %2470 = vmatprep.subr.bf16.mxu0 %v3428_v27 }
 0xda0   :  { %v2242_v5 = vpop.xlane.xlu1 %2241  ;;  %v4355_v44 = vsub.f32 %v2227_v31, %v2252_v36  ;;  %2278 = vadd.xlane.f32.xlu1 %v2267_v45  ;;  %v3440_v31 = vld [vmem:[%s4598_s9 + $0x70] sm:$0xff]  }
 0xda1   :  { %v2253_v15 = vmul.f32 0.0078125, %v2242_v5  ;;  %v2244_v30 = vpop.xlane.xlu0 %2243  ;;  %3113 = vmatprep.subr.bf16.mxu1 %v3440_v31 }
 0xda2   :  { %v2254_v16 = vmul.f32 0.0078125, %v2244_v30  ;;  %v2268_v7 = vmul.f32 %v4355_v44, %v4355_v44  ;;  %2471 = vmatpush1.bf16.msra.mxu0 %v3426_v43  ;;  %3114 = vmatpush3.bf16.msra.mxu1 %v3441_v61 }
 0xda3   :  { %v4357_v28 = vsub.f32 %v2228_v1, %v2253_v15  ;;  %2472 = vmatprep.subr.bf16.mxu0 %v3431_v59  ;;  %3115 = vmatprep.subr.bf16.mxu1 %v3442_v47  ;;  %v3445_v1 = vld [vmem:[%s4598_s9 + $0x20] sm:$0xff]  }
 0xda4   :  { %v2246_v4 = vpop.xlane.xlu1 %2245  ;;  %v4361_v24 = vsub.f32 %v2229_v37, %v2254_v16  ;;  %2280 = vadd.xlane.f32.xlu0 %v2268_v7  ;;  %v3447_v37 = vld [vmem:[%s4598_s9 + $0x18] sm:$0xff]  }
 0xda5   :  { %v2255_v26 = vmul.f32 0.0078125, %v2246_v4  ;;  %v2269_v35 = vmul.f32 %v4357_v28, %v4357_v28 }
 0xda6   :  { %v2270_v55 = vmul.f32 %v4361_v24, %v4361_v24  ;;  %2473 = vmatpush1.bf16.msra.mxu0 %v3429_v33  ;;  %3116 = vmatpush3.bf16.msra.mxu1 %v3443_v49 }
 0xda7   :  { %v4371_v14 = vsub.f32 %v2230_v19, %v2255_v26  ;;  %2282 = vadd.xlane.f32.xlu1 %v2269_v35  ;;  %2474 = vmatprep.subr.bf16.mxu0 %v3434_v46  ;;  %v4447_v26 = vld [vmem:[%s4594_s5] ss:$0 sm:$0xff] }
 0xda8   :  { %2284 = vadd.xlane.f32.xlu0 %v2270_v55  ;;  %3117 = vmatprep.subr.bf16.mxu1 %v3444_v62 }
 0xda9   :  { %v2271_v41 = vmul.f32 %v4371_v14, %v4371_v14 }
 0xdaa   :  { %2475 = vmatpush1.bf16.msra.mxu0 %v3432_v10  ;;  %3118 = vmatpush3.bf16.msra.mxu1 %v3445_v1 }
 0xdab   :  { %2286 = vadd.xlane.f32.xlu1 %v2271_v41  ;;  %2476 = vmatprep.subr.bf16.mxu0 %v3437_v42 }
 0xdac   :  { %3119 = vmatprep.subr.bf16.mxu1 %v3446_v6 }
 0xdae   :  { %2477 = vmatpush1.bf16.msra.mxu0 %v3435_v34  ;;  %3120 = vmatpush3.bf16.msra.mxu1 %v3447_v37 }
 0xe21   :  { %v2273_v57 = vpop.xlane.xlu0 %2272 }
 0xe22   :  { %v2288_v19 = vmul.f32 0.0078125, %v2273_v57 }
 0xe24   :  { %v2296_v56 = vadd.f32 1e-06, %v2288_v19 }
 0xe25   :  { %v2277_v20 = vpop.xlane.xlu0 %2276  ;;  %v2275_v21 = vpop.xlane.xlu1 %2274 }
 0xe26   :  { %3582 = vrsqrt.f32 %v2296_v56  ;;  %v2290_v9 = vmul.f32 0.0078125, %v2277_v20  ;;  %v2289_v22 = vmul.f32 0.0078125, %v2275_v21  ;;  %v3449_v20 = vld [vmem:[%s4598_s9 + $0x10] sm:$0xff]   ;;  %v3451_v21 = vld [vmem:[%s4598_s9 + $0x8] sm:$0xff]  }
 0xe28   :  { %v2297_v53 = vadd.f32 1e-06, %v2289_v22  ;;  %v2298_v8 = vadd.f32 1e-06, %v2290_v9  ;;  %v3452_v9 = vld [vmem:[%s4598_s9 + $0x40] sm:$0xff]  }
 0xe29   :  { %v2279_v11 = vpop.xlane.xlu1 %2278  ;;  %v3453_v22 = vld [vmem:[%s4598_s9] sm:$0xff]  }
 0xe2a   :  { %v2291_v63 = vmul.f32 0.0078125, %v2279_v11  ;;  %3584 = vrsqrt.f32 %v2297_v53  ;;  %v2370_v53 = vld [vmem:[%s4597_s8] sm:$0x3] }
 0xe2b   :  { %3586 = vrsqrt.f32 %v2298_v8  ;;  %v2379_v11 = vrot.slane %v2370_v53, %v92_v50 }
 0xe2c   :  { %v2299_v60 = vadd.f32 1e-06, %v2291_v63  ;;  %v2375_v63 = vrot.slane %v2370_v53, %v88_v39 }
 0xe2d   :  { %v2281_v52 = vpop.xlane.xlu0 %2280 }
 0xe2e   :  { %3588 = vrsqrt.f32 %v2299_v60  ;;  %v2292_v23 = vmul.f32 0.0078125, %v2281_v52 }
 0xe30   :  { %v2283_v18 = vpop.xlane.xlu1 %2282  ;;  %v2300_v36 = vadd.f32 1e-06, %v2292_v23 }
 0xe31   :  { %v2293_v13 = vmul.f32 0.0078125, %v2283_v18  ;;  %v2285_v5 = vpop.xlane.xlu0 %2284 }
 0xe32   :  { %v2294_v7 = vmul.f32 0.0078125, %v2285_v5 }
 0xe33   :  { %v2301_v45 = vadd.f32 1e-06, %v2293_v13  ;;  %v3583_v15 = vpop.eup %3582 }
 0xe34   :  { %v2287_v30 = vpop.xlane.xlu1 %2286  ;;  %v2312_v4 = vmul.f32 %v3583_v15, %v4339_v54  ;;  %v2302_v29 = vadd.f32 1e-06, %v2294_v7 }
 0xe35   :  { %3590 = vrsqrt.f32 %v2301_v45  ;;  %v2295_v16 = vmul.f32 0.0078125, %v2287_v30 }
 0xe36   :  { %3592 = vrsqrt.f32 %v2300_v36  ;;  %v2327_v41 = vmul.f32 %v4447_v26, %v2312_v4 }
 0xe37   :  { %v2303_v35 = vadd.f32 1e-06, %v2295_v16  ;;  %v3585_v32 = vpop.eup %3584 }
 0xe38   :  { %v2313_v55 = vmul.f32 %v3585_v32, %v4345_v40  ;;  %v3587_v58 = vpop.eup %3586  ;;  %v4459_v27 = vadd.f32 %v4454_v12, %v2327_v41 }
 0xe39   :  { %3594 = vrsqrt.f32 %v2303_v35  ;;  %v2314_v43 = vmul.f32 %v3587_v58, %v4343_v48 }
 0xe3a   :  { %v2328_v54 = vmul.f32 %v4447_v26, %v2313_v55  ;;  %3596 = vrsqrt.f32 %v2302_v29 }
 0xe3b   :  { %v3589_v51 = vpop.eup %3588  ;;  %v2329_v46 = vmul.f32 %v4447_v26, %v2314_v43 }
 0xe3c   :  { %v2315_v25 = vmul.f32 %v3589_v51, %v4351_v3  ;;  %v4462_v40 = vadd.f32 %v4454_v12, %v2328_v54 }
 0xe3d   :  { %v4475_v17 = vadd.f32 %v4454_v12, %v2329_v46 }
 0xe3e   :  { %v2350_v59 = vpack.c.bf16 %v4462_v40, %v4459_v27  ;;  %v2330_v33 = vmul.f32 %v4447_v26, %v2315_v25 }
 0xe40   :  { %2495 = vmatmul.mubr.bf16.vlgmr.msra.gmra.mxu0 %v2350_v59  ;;  %v4471_v3 = vadd.f32 %v4454_v12, %v2330_v33 }
 0xe41   :  { %2504 = vmatprep.mubr.bf16.mxu0 %v3644_v2 }
 0xe42   :  { %v3591_v10 = vpop.eup %3590  ;;  %v2351_v0 = vpack.c.bf16 %v4471_v3, %v4475_v17 }
 0xe43   :  { %v3593_v42 = vpop.eup %3592  ;;  %v2317_v34 = vmul.f32 %v3591_v10, %v4357_v28 }
 0xe44   :  { %v2316_v48 = vmul.f32 %v3593_v42, %v4355_v44 }
 0xe45   :  { %v2332_v31 = vmul.f32 %v4447_v26, %v2317_v34 }
 0xe46   :  { %v3595_v61 = vpop.eup %3594  ;;  %v2331_v47 = vmul.f32 %v4447_v26, %v2316_v48 }
 0xe47   :  { %v3597_v49 = vpop.eup %3596  ;;  %v4484_v62 = vadd.f32 %v4454_v12, %v2332_v31  ;;  %v2319_v28 = vmul.f32 %v3595_v61, %v4371_v14 }
 0xe48   :  { %2505 = vmatmul.mubr.bf16.gmra.mxu0 %v2351_v0  ;;  %v4488_v1 = vadd.f32 %v4454_v12, %v2331_v47  ;;  %v2318_v44 = vmul.f32 %v3597_v49, %v4361_v24  ;;  %v3448_v24 = vld [vmem:[%s4598_s9 + $0x50] sm:$0xff]  }
 0xe49   :  { %2514 = vmatprep.mubr.bf16.mxu0 %v3644_v2  ;;  %v2334_v37 = vmul.f32 %v4447_v26, %v2319_v28  ;;  %3121 = vmatprep.subr.bf16.mxu1 %v3448_v24 }
 0xe4a   :  { %v2352_v6 = vpack.c.bf16 %v4484_v62, %v4488_v1  ;;  %v2333_v57 = vmul.f32 %v4447_v26, %v2318_v44  ;;  %3122 = vmatpush3.bf16.msra.mxu1 %v3449_v20 }
 0xe4b   :  { %v4497_v19 = vadd.f32 %v4454_v12, %v2334_v37 }
 0xe4c   :  { %v4500_v14 = vadd.f32 %v4454_v12, %v2333_v57 }
 0xe4e   :  { %v2353_v56 = vpack.c.bf16 %v4497_v19, %v4500_v14 }
 0xe50   :  { %2515 = vmatmul.mubr.bf16.gmra.mxu0 %v2352_v6 }
 0xe51   :  { %2524 = vmatprep.mubr.bf16.mxu0 %v3644_v2  ;;  %v3450_v2 = vld [vmem:[%s4598_s9 + $0x48] sm:$0xff]  }
 0xe52   :  { %3123 = vmatprep.subr.bf16.mxu1 %v3450_v2 }
 0xe53   :  { %3124 = vmatpush3.bf16.msra.mxu1 %v3451_v21 }
 0xe54   :  { %3125 = vmatprep.subr.bf16.mxu1 %v3452_v9 }
 0xe57   :  { %3126 = vmatpush3.bf16.msra.mxu1 %v3453_v22 }
 0xe58   :  { %2525 = vmatmul.mubr.bf16.gmra.mxu0 %v2353_v56 }
 0xf00   :  { %v2496_v8 = vpop.f32.mrf.mxu0 }
 0xf01   :  { %v2497_v13 = vadd.f32 %v2496_v8, %v2375_v63 }
 0xf02   :  { %v2498_v60 = vpop.f32.mrf.mxu0 }
 0xf03   :  { %v2499_v23 = vadd.f32 %v2498_v60, %v2379_v11  ;;  %v2535_v7 = vmax.f32 %v2497_v13, 0.0  ;;  %v2994_v13 = vld [vmem:[%s4599_s10] ss:$0 sm:$0xff]  ;;  %s3648_s10 = smov [#allocation2]  }
 0xf04   :  { %v2500_v52 = vpop.f32.mrf.mxu0  ;;  %s2884_s13 = sshll.u32 %s3648_s10, 4  ;;  %s2885_s13 = int_to_ptr.vmem [resolvable:$true] %s2884_s13 }
 0xf05   :  { %v2501_v18 = vadd.f32 %v2500_v52, %v2375_v63  ;;  %v2536_v30 = vmax.f32 %v2499_v23, 0.0  ;;  %s3622_s14 = scalar_lea.vmem %s2885_s13, 1024  ;;  %p3627_p1 = scmp.lt.s32.totalorder %s2885_s13, %s2885_s13 }
 0xf06   :  { %v2502_v36 = vpop.f32.mrf.mxu0  ;;  %p3623_p0 = scmp.ne.s32.totalorder %s2885_s13, %s3622_s14  ;;  %p3628_p2 = scmp.lt.s32.totalorder %s3622_s14, %s3622_s14 }
 0xf07   :  { %v2503_v45 = vadd.f32 %v2502_v36, %v2379_v11  ;;  %v2537_v5 = vmax.f32 %v2501_v18, 0.0 }
 0xf08   :  { %v2506_v15 = vpop.f32.mrf.mxu0  ;;  %p3629_p3 = por %p3628_p2, %p3627_p1 }
 0xf09   :  { %v2538_v16 = vmax.f32 %v2503_v45, 0.0  ;;  %v2551_v32 = vpack.c.bf16 %v2537_v5, %v2535_v7  ;;  %v2507_v38 = vadd.f32 %v2506_v15, %v2375_v63 }
 0xf0a   :  { %v2508_v4 = vpop.f32.mrf.mxu0  ;;  %p3630_p4 = pnand %p3629_p3, %p3623_p0 }
 0xf0b   :  { %v2552_v35 = vpack.c.bf16 %v2538_v16, %v2536_v30  ;;  %v2509_v50 = vadd.f32 %v2508_v4, %v2379_v11  ;;  %v2539_v43 = vmax.f32 %v2507_v38, 0.0 }
 0xf0c   :  { %v2510_v29 = vpop.f32.mrf.mxu0 }
 0xf0d   :  { %v2511_v55 = vadd.f32 %v2510_v29, %v2375_v63  ;;  %2726 = vmatprep.mubr.bf16.mxu1 %v2552_v35  ;;  %v2540_v54 = vmax.f32 %v2509_v50, 0.0 }
 0xf0e   :  { %v2512_v39 = vpop.f32.mrf.mxu0  ;;  %2727 = vmatmul.mubr.bf16.vlgmr.msra.gmra.mxu1 %v2551_v32 }
 0xf0f   :  { %v2513_v41 = vadd.f32 %v2512_v39, %v2379_v11  ;;  %v2541_v58 = vmax.f32 %v2511_v55, 0.0 }
 0xf10   :  { %v2516_v51 = vpop.f32.mrf.mxu0 }
 0xf11   :  { %v2542_v25 = vmax.f32 %v2513_v41, 0.0  ;;  %v2553_v10 = vpack.c.bf16 %v2541_v58, %v2539_v43  ;;  %v2517_v48 = vadd.f32 %v2516_v51, %v2375_v63 }
 0xf12   :  { %v2518_v59 = vpop.f32.mrf.mxu0 }
 0xf13   :  { %v2554_v33 = vpack.c.bf16 %v2542_v25, %v2540_v54  ;;  %v2519_v42 = vadd.f32 %v2518_v59, %v2379_v11  ;;  %v2543_v44 = vmax.f32 %v2517_v48, 0.0 }
 0xf14   :  { %v2520_v46 = vpop.f32.mrf.mxu0 }
 0xf15   :  { %v2521_v34 = vadd.f32 %v2520_v46, %v2375_v63  ;;  %2734 = vmatprep.mubr.bf16.mxu1 %v2554_v33  ;;  %v2544_v49 = vmax.f32 %v2519_v42, 0.0 }
 0xf16   :  { %v2522_v0 = vpop.f32.mrf.mxu0  ;;  %2735 = vmatmul.mubr.bf16.gmra.mxu1 %v2553_v10 }
 0xf17   :  { %v2523_v31 = vadd.f32 %v2522_v0, %v2379_v11  ;;  %v2545_v61 = vmax.f32 %v2521_v34, 0.0 }
 0xf18   :  { %v2526_v47 = vpop.f32.mrf.mxu0 }
 0xf19   :  { %v2546_v28 = vmax.f32 %v2523_v31, 0.0  ;;  %v2555_v57 = vpack.c.bf16 %v2545_v61, %v2543_v44  ;;  %v2527_v2 = vadd.f32 %v2526_v47, %v2375_v63 }
 0xf1a   :  { %v2528_v6 = vpop.f32.mrf.mxu0 }
 0xf1b   :  { %v2556_v37 = vpack.c.bf16 %v2546_v28, %v2544_v49  ;;  %v2529_v24 = vadd.f32 %v2528_v6, %v2379_v11  ;;  %v2547_v60 = vmax.f32 %v2527_v2, 0.0 }
 0xf1c   :  { %v2530_v56 = vpop.f32.mrf.mxu0 }
 0xf1d   :  { %v2531_v20 = vadd.f32 %v2530_v56, %v2375_v63  ;;  %2742 = vmatprep.mubr.bf16.mxu1 %v2556_v37  ;;  %v2548_v53 = vmax.f32 %v2529_v24, 0.0 }
 0xf1e   :  { %v2532_v21 = vpop.f32.mrf.mxu0  ;;  %2743 = vmatmul.mubr.bf16.gmra.mxu1 %v2555_v57 }
 0xf1f   :  { %v2533_v9 = vadd.f32 %v2532_v21, %v2379_v11  ;;  %v2549_v22 = vmax.f32 %v2531_v20, 0.0 }
 0xf21   :  { %v2550_v8 = vmax.f32 %v2533_v9, 0.0  ;;  %v2557_v23 = vpack.c.bf16 %v2549_v22, %v2547_v60 }
 0xf23   :  { %v2558_v52 = vpack.c.bf16 %v2550_v8, %v2548_v53 }
 0xf25   :  { %2750 = vmatprep.mubr.bf16.mxu1 %v2558_v52 }
 0xf26   :  { %2751 = vmatmul.mubr.bf16.gmra.mxu1 %v2557_v23 }
 0xfce   :  { %v3127_v18 = vpop.f32.mrf.mxu1 }
 0xfd0   :  { %v3128_v36 = vpop.f32.mrf.mxu1 }
 0xfd1   :  { %v3129_v45 = vadd.f32 %v3128_v36, %v3127_v18 }
 0xfd2   :  { %v3130_v5 = vpop.f32.mrf.mxu1 }
 0xfd3   :  { %v2729_v63 = vadd.f32 %v3129_v45, %v2994_v13 }
 0xfd4   :  { %v3131_v15 = vpop.f32.mrf.mxu1 }
 0xfd5   :  { %v3132_v30 = vadd.f32 %v3131_v15, %v3130_v5  ;;  %v2759_v11 = vadd.f32 %v2729_v63, %v4459_v27 }
 0xfd6   :  { %v3133_v16 = vpop.f32.mrf.mxu1 }
 0xfd7   :  { %v2732_v7 = vadd.f32 %v3132_v30, %v2994_v13  ;;  %2767 = vadd.xlane.f32.xlu0 %v2759_v11 }
 0xfd8   :  { %v3134_v4 = vpop.f32.mrf.mxu1 }
 0xfd9   :  { %v3135_v35 = vadd.f32 %v3134_v4, %v3133_v16  ;;  %v2760_v32 = vadd.f32 %v2732_v7, %v4462_v40 }
 0xfda   :  { %v3136_v29 = vpop.f32.mrf.mxu1 }
 0xfdb   :  { %v2737_v50 = vadd.f32 %v3135_v35, %v2994_v13  ;;  %2769 = vadd.xlane.f32.xlu1 %v2760_v32 }
 0xfdc   :  { %v3137_v55 = vpop.f32.mrf.mxu1 }
 0xfdd   :  { %v3138_v38 = vadd.f32 %v3137_v55, %v3136_v29  ;;  %v2761_v39 = vadd.f32 %v2737_v50, %v4475_v17 }
 0xfde   :  { %v3139_v41 = vpop.f32.mrf.mxu1 }
 0xfdf   :  { %v2740_v58 = vadd.f32 %v3138_v38, %v2994_v13  ;;  %2771 = vadd.xlane.f32.xlu0 %v2761_v39 }
 0xfe0   :  { %v3140_v51 = vpop.f32.mrf.mxu1 }
 0xfe1   :  { %v3141_v54 = vadd.f32 %v3140_v51, %v3139_v41  ;;  %v2762_v27 = vadd.f32 %v2740_v58, %v4471_v3 }
 0xfe2   :  { %v3142_v25 = vpop.f32.mrf.mxu1 }
 0xfe3   :  { %v2745_v43 = vadd.f32 %v3141_v54, %v2994_v13  ;;  %2773 = vadd.xlane.f32.xlu1 %v2762_v27 }
 0xfe4   :  { %v3143_v59 = vpop.f32.mrf.mxu1 }
 0xfe5   :  { %v3144_v33 = vadd.f32 %v3143_v59, %v3142_v25  ;;  %v2763_v40 = vadd.f32 %v2745_v43, %v4488_v1 }
 0xfe6   :  { %v3145_v10 = vpop.f32.mrf.mxu1 }
 0xfe7   :  { %v2748_v46 = vadd.f32 %v3144_v33, %v2994_v13  ;;  %2775 = vadd.xlane.f32.xlu0 %v2763_v40 }
 0xfe8   :  { %v3146_v42 = vpop.f32.mrf.mxu1 }
 0xfe9   :  { %v3147_v34 = vadd.f32 %v3146_v42, %v3145_v10  ;;  %v2764_v17 = vadd.f32 %v2748_v46, %v4484_v62 }
 0xfea   :  { %v3148_v48 = vpop.f32.mrf.mxu1 }
 0xfeb   :  { %v2753_v0 = vadd.f32 %v3147_v34, %v2994_v13  ;;  %2777 = vadd.xlane.f32.xlu1 %v2764_v17 }
 0xfec   :  { %v3149_v31 = vpop.f32.mrf.mxu1 }
 0xfed   :  { %v3150_v61 = vadd.f32 %v3149_v31, %v3148_v48  ;;  %v2765_v3 = vadd.f32 %v2753_v0, %v4500_v14 }
 0xfef   :  { %v2756_v47 = vadd.f32 %v3150_v61, %v2994_v13  ;;  %2779 = vadd.xlane.f32.xlu0 %v2765_v3 }
 0xff1   :  { %v2766_v49 = vadd.f32 %v2756_v47, %v4497_v19 }
 0xff3   :  { %2781 = vadd.xlane.f32.xlu1 %v2766_v49 }
0x1060   :  { %v2768_v1 = vpop.xlane.xlu0 %2767 }
0x1061   :  { %v2783_v28 = vmul.f32 0.0078125, %v2768_v1 }
0x1063   :  { %v2791_v44 = vsub.f32 %v2759_v11, %v2783_v28 }
0x1064   :  { %v2770_v6 = vpop.xlane.xlu1 %2769 }
0x1065   :  { %v2784_v37 = vmul.f32 0.0078125, %v2770_v6  ;;  %v2799_v57 = vmul.f32 %v2791_v44, %v2791_v44 }
0x1067   :  { %v2792_v56 = vsub.f32 %v2760_v32, %v2784_v37  ;;  %2807 = vadd.xlane.f32.xlu0 %v2799_v57 }
0x1068   :  { %v2772_v62 = vpop.xlane.xlu0 %2771 }
0x1069   :  { %v2785_v24 = vmul.f32 0.0078125, %v2772_v62  ;;  %v2800_v20 = vmul.f32 %v2792_v56, %v2792_v56 }
0x106b   :  { %v4540_v2 = vsub.f32 %v2761_v39, %v2785_v24  ;;  %2809 = vadd.xlane.f32.xlu1 %v2800_v20 }
0x106c   :  { %v2774_v14 = vpop.xlane.xlu1 %2773 }
0x106d   :  { %v2786_v21 = vmul.f32 0.0078125, %v2774_v14  ;;  %v2801_v19 = vmul.f32 %v4540_v2, %v4540_v2 }
0x106f   :  { %v4544_v9 = vsub.f32 %v2762_v27, %v2786_v21  ;;  %2811 = vadd.xlane.f32.xlu0 %v2801_v19 }
0x1070   :  { %v2776_v22 = vpop.xlane.xlu0 %2775 }
0x1071   :  { %v2787_v53 = vmul.f32 0.0078125, %v2776_v22  ;;  %v2802_v8 = vmul.f32 %v4544_v9, %v4544_v9 }
0x1073   :  { %v4548_v60 = vsub.f32 %v2763_v40, %v2787_v53  ;;  %2813 = vadd.xlane.f32.xlu1 %v2802_v8 }
0x1074   :  { %v2778_v52 = vpop.xlane.xlu1 %2777 }
0x1075   :  { %v2788_v23 = vmul.f32 0.0078125, %v2778_v52  ;;  %v2803_v18 = vmul.f32 %v4548_v60, %v4548_v60 }
0x1077   :  { %v4552_v13 = vsub.f32 %v2764_v17, %v2788_v23  ;;  %2815 = vadd.xlane.f32.xlu0 %v2803_v18 }
0x1078   :  { %v2780_v36 = vpop.xlane.xlu0 %2779 }
0x1079   :  { %v2789_v45 = vmul.f32 0.0078125, %v2780_v36  ;;  %v2804_v5 = vmul.f32 %v4552_v13, %v4552_v13 }
0x107b   :  { %v4556_v63 = vsub.f32 %v2765_v3, %v2789_v45  ;;  %2817 = vadd.xlane.f32.xlu1 %v2804_v5 }
0x107c   :  { %v2782_v15 = vpop.xlane.xlu1 %2781 }
0x107d   :  { %v2790_v30 = vmul.f32 0.0078125, %v2782_v15  ;;  %v2805_v11 = vmul.f32 %v4556_v63, %v4556_v63 }
0x107f   :  { %v4560_v16 = vsub.f32 %v2766_v49, %v2790_v30  ;;  %2819 = vadd.xlane.f32.xlu0 %v2805_v11 }
0x1081   :  { %v2806_v7 = vmul.f32 %v4560_v16, %v4560_v16 }
0x1083   :  { %2821 = vadd.xlane.f32.xlu1 %v2806_v7 }
0x10f0   :  { %v2808_v4 = vpop.xlane.xlu0 %2807 }
0x10f1   :  { %v2823_v35 = vmul.f32 0.0078125, %v2808_v4 }
0x10f3   :  { %v2831_v32 = vadd.f32 1e-06, %v2823_v35 }
0x10f4   :  { %v2810_v29 = vpop.xlane.xlu1 %2809 }
0x10f5   :  { %3598 = vrsqrt.f32 %v2831_v32  ;;  %v2824_v50 = vmul.f32 0.0078125, %v2810_v29 }
0x10f7   :  { %v2832_v55 = vadd.f32 1e-06, %v2824_v50 }
0x10f8   :  { %v2812_v38 = vpop.xlane.xlu0 %2811 }
0x10f9   :  { %3600 = vrsqrt.f32 %v2832_v55  ;;  %v2825_v39 = vmul.f32 0.0078125, %v2812_v38 }
0x10fb   :  { %v2833_v41 = vadd.f32 1e-06, %v2825_v39 }
0x10fc   :  { %v2814_v58 = vpop.xlane.xlu1 %2813 }
0x10fd   :  { %3602 = vrsqrt.f32 %v2833_v41  ;;  %v2826_v51 = vmul.f32 0.0078125, %v2814_v58 }
0x10ff   :  { %v2834_v54 = vadd.f32 1e-06, %v2826_v51 }
0x1100   :  { %v2816_v27 = vpop.xlane.xlu0 %2815 }
0x1101   :  { %3604 = vrsqrt.f32 %v2834_v54  ;;  %v2827_v25 = vmul.f32 0.0078125, %v2816_v27 }
0x1102   :  { %v3599_v43 = vpop.eup %3598 }
0x1103   :  { %v2847_v59 = vmul.f32 %v3599_v43, %v2791_v44  ;;  %v2835_v33 = vadd.f32 1e-06, %v2827_v25 }
0x1104   :  { %v2818_v40 = vpop.xlane.xlu1 %2817 }
0x1105   :  { %v2855_v10 = vmul.f32 %v4447_v26, %v2847_v59  ;;  %3606 = vrsqrt.f32 %v2835_v33  ;;  %v2828_v46 = vmul.f32 0.0078125, %v2818_v40 }
0x1106   :  { %v3601_v42 = vpop.eup %3600 }
0x1107   :  { %v2863_v34 = vadd.f32 %v4454_v12, %v2855_v10  ;;  %v2848_v17 = vmul.f32 %v3601_v42, %v2792_v56  ;;  %v2836_v48 = vadd.f32 1e-06, %v2828_v46 }
0x1108   :  { %v2820_v0 = vpop.xlane.xlu0 %2819 }
0x1109   :  { %2871 = vst [vmem:[#allocation2] sm:$0xff] %v2863_v34  ;;  %v2856_v31 = vmul.f32 %v4447_v26, %v2848_v17  ;;  %3608 = vrsqrt.f32 %v2836_v48  ;;  %v2829_v61 = vmul.f32 0.0078125, %v2820_v0 }
0x110a   :  { %v3603_v3 = vpop.eup %3602 }
0x110b   :  { %v2864_v47 = vadd.f32 %v4454_v12, %v2856_v31  ;;  %v2849_v49 = vmul.f32 %v3603_v3, %v4540_v2  ;;  %v2837_v1 = vadd.f32 1e-06, %v2829_v61 }
0x110c   :  { %v2822_v28 = vpop.xlane.xlu1 %2821 }
0x110d   :  { %2872 = vst [vmem:[#allocation2 + $0x8] sm:$0xff] %v2864_v47  ;;  %v2857_v44 = vmul.f32 %v4447_v26, %v2849_v49  ;;  %3610 = vrsqrt.f32 %v2837_v1  ;;  %v2830_v6 = vmul.f32 0.0078125, %v2822_v28 }
0x110e   :  { %v3605_v37 = vpop.eup %3604 }
0x110f   :  { %v2865_v57 = vadd.f32 %v4454_v12, %v2857_v44  ;;  %v2850_v56 = vmul.f32 %v3605_v37, %v4544_v9  ;;  %v2838_v62 = vadd.f32 1e-06, %v2830_v6 }
0x1111   :  { %2873 = vst [vmem:[#allocation2 + $0x10] sm:$0xff] %v2865_v57  ;;  %v2858_v24 = vmul.f32 %v4447_v26, %v2850_v56  ;;  %3612 = vrsqrt.f32 %v2838_v62 }
0x1112   :  { %v3607_v20 = vpop.eup %3606 }
0x1113   :  { %v2866_v2 = vadd.f32 %v4454_v12, %v2858_v24  ;;  %v2851_v14 = vmul.f32 %v3607_v20, %v4548_v60 }
0x1115   :  { %2874 = vst [vmem:[#allocation2 + $0x18] sm:$0xff] %v2866_v2  ;;  %v2859_v21 = vmul.f32 %v4447_v26, %v2851_v14 }
0x1116   :  { %v3609_v19 = vpop.eup %3608 }
0x1117   :  { %v2867_v22 = vadd.f32 %v4454_v12, %v2859_v21  ;;  %v2852_v53 = vmul.f32 %v3609_v19, %v4552_v13 }
0x1119   :  { %2875 = vst [vmem:[#allocation2 + $0x20] sm:$0xff] %v2867_v22  ;;  %v2860_v9 = vmul.f32 %v4447_v26, %v2852_v53 }
0x111a   :  { %v3611_v8 = vpop.eup %3610 }
0x111b   :  { %v2868_v52 = vadd.f32 %v4454_v12, %v2860_v9  ;;  %v2853_v23 = vmul.f32 %v3611_v8, %v4556_v63 }
0x111d   :  { %2876 = vst [vmem:[#allocation2 + $0x28] sm:$0xff] %v2868_v52  ;;  %v2861_v18 = vmul.f32 %v4447_v26, %v2853_v23 }
0x111e   :  { %v3613_v60 = vpop.eup %3612 }
0x111f   :  { %v2869_v36 = vadd.f32 %v4454_v12, %v2861_v18  ;;  %v2854_v45 = vmul.f32 %v3613_v60, %v4560_v16 }
0x1121   :  { %2877 = vst [vmem:[#allocation2 + $0x30] sm:$0xff] %v2869_v36  ;;  %v2862_v13 = vmul.f32 %v4447_v26, %v2854_v45 }
0x1123   :  { %v2870_v5 = vadd.f32 %v4454_v12, %v2862_v13 }
0x1125   :  { %2878 = vst [vmem:[#allocation2 + $0x38] sm:$0xff] %v2870_v5 }
0x1126   :  { %3633 = shalt.err (!%p3630_p4)
}
0x1127   :  { %s3649_s15 = smov 128   ;;  %s3650_s16 = smov 8  }
0x1128   :  { %2890 = dma.vmem_to_hbm [thread:$0]  %s2885_s13, 1024, %s4600_s11, [#allocation3], %s3649_s15, %s3649_s15, %s3650_s16  }
0x1129   :  { %3642 = dma.done.wait [#allocation3], 1024  }
0x112a   :  { %3643 = vsyncadd [#allocation3], 4294966272 }
0x112b   :  { %2894 = vsyncpa [#allocation3], 1 }

</bundles_post_ra>
